<compile_context>
chip_gen: v5e
topology: v5e:2x2
jax: 0.10.0
libtpu: 0.0.40
codegen_flags: <defaults>
</compile_context>

<pallas_src>
import functools

import jax
import jax.numpy as jnp
from jax.experimental import pallas as pl
from jax.experimental.pallas import tpu as pltpu

BN_EPS = 1e-5
_VMEM_LIMIT = 32 * 1024 * 1024
_DEFAULT_TILE_ROWS = 4096


def _pick_tile(total, target, multiple):
    """Largest divisor of `total` that is <= target and a multiple of `multiple`.
    Falls back to the full extent (always a legal block shape)."""
    d = min(total, target)
    while d >= multiple:
        if total % d == 0 and d % multiple == 0:
            return d
        d -= 1
    return total


def _layer_kernel(*refs, apply_bn, add_bias):
    """[folded BN + ReLU] -> matmul -> activation tile + per-tile (sum, M2)."""
    idx = 0
    x_ref = refs[idx]; idx += 1
    if apply_bn:
        affine_ref = refs[idx]; idx += 1
    w_ref = refs[idx]; idx += 1
    if add_bias:
        b_ref = refs[idx]; idx += 1
    y_ref, stats_ref = refs[idx], refs[idx + 1]

    h = x_ref[...]
    if apply_bn:
        # BN folded into one per-channel scale/shift pass (+ ReLU); the
        # scale/shift were computed on host from the previous layer's stats.
        h = jnp.maximum(h * affine_ref[0:1, :] + affine_ref[1:2, :], 0.0)

    y = jnp.dot(h.astype(w_ref.dtype), w_ref[...],
                preferred_element_type=jnp.float32)
    if add_bias:
        y = y + b_ref[...]
    y_ref[...] = y

    # Per-tile partial statistics for the *next* BN, centered on the tile mean
    # so the host-side combine never hits E[x^2] - mean^2 cancellation.
    rows = y.shape[0]
    tsum = jnp.sum(y, axis=0, keepdims=True)
    diff = y - tsum * (1.0 / rows)
    stats_ref[0:1, :] = tsum
    stats_ref[1:2, :] = jnp.sum(diff * diff, axis=0, keepdims=True)


def _layer_call(x2, w, affine, bias, tile_rows, matmul_dtype):
    m, cin = x2.shape
    cout = w.shape[1]
    n_tiles = m // tile_rows

    args = [x2]
    in_specs = [pl.BlockSpec((tile_rows, cin), lambda i: (i, 0))]
    if affine is not None:
        args.append(affine)
        in_specs.append(pl.BlockSpec((2, cin), lambda i: (0, 0)))
    args.append(w.astype(matmul_dtype))
    in_specs.append(pl.BlockSpec((cin, cout), lambda i: (0, 0)))
    if bias is not None:
        args.append(bias)
        in_specs.append(pl.BlockSpec((1, cout), lambda i: (0, 0)))

    y, stats = pl.pallas_call(
        functools.partial(_layer_kernel,
                          apply_bn=affine is not None,
                          add_bias=bias is not None),
        grid=(n_tiles,),
        in_specs=in_specs,
        out_specs=(
            pl.BlockSpec((tile_rows, cout), lambda i: (i, 0)),
            pl.BlockSpec((None, 2, cout), lambda i: (i, 0, 0)),
        ),
        out_shape=(
            jax.ShapeDtypeStruct((m, cout), jnp.float32),
            jax.ShapeDtypeStruct((n_tiles, 2, cout), jnp.float32),
        ),
        compiler_params=pltpu.CompilerParams(
            dimension_semantics=("parallel",),
            vmem_limit_bytes=_VMEM_LIMIT),
    )(*args)
    return y, stats


def _finalize_bn(stats, n_rows, tile_rows, gamma, beta):
    """Exact combine of per-tile (sum, M2) -> folded BN (scale, shift) as (2, C)."""
    tsum = stats[:, 0, :]                                    # (T, C)
    tm2 = stats[:, 1, :]                                     # (T, C)
    mean = jnp.sum(tsum, axis=0, keepdims=True) / n_rows     # (1, C)
    tmean = tsum / tile_rows
    m2 = (jnp.sum(tm2, axis=0, keepdims=True)
          + tile_rows * jnp.sum((tmean - mean) ** 2, axis=0, keepdims=True))
    var = m2 / n_rows                                        # biased, as in BN training
    scale = gamma * jax.lax.rsqrt(var + BN_EPS)
    shift = beta - mean * scale
    return jnp.concatenate([scale, shift], axis=0)           # (2, C)


def _ring_max_kernel(y_ref, affine_ref, out_ref, *, n_points):
    h = jnp.maximum(y_ref[...] * affine_ref[0:1, :] + affine_ref[1:2, :], 0.0)
    rows, d = h.shape
    # Leading-dim split; layout-preserving when n_points is sublane-aligned.
    v = h.reshape(rows // n_points, n_points, d)
    # Static pairwise-maximum tree over the points axis (stays on the VPU).
    p = n_points
    while p > 1:
        half = p // 2
        m = jnp.maximum(v[:, :half, :], v[:, half:2 * half, :])
        if p % 2:
            m = jnp.maximum(m, v[:, 2 * half:, :])
        v, p = m, half
    out_ref[...] = v[:, 0, :]


def _ring_max_call(y5, affine5, rings_total, n_points, tile_rings):
    m, d = y5.shape
    return pl.pallas_call(
        functools.partial(_ring_max_kernel, n_points=n_points),
        grid=(rings_total // tile_rings,),
        in_specs=[
            pl.BlockSpec((tile_rings * n_points, d), lambda i: (i, 0)),
            pl.BlockSpec((2, d), lambda i: (0, 0)),
        ],
        out_specs=pl.BlockSpec((tile_rings, d), lambda i: (i, 0)),
        out_shape=jax.ShapeDtypeStruct((rings_total, d), jnp.float32),
        compiler_params=pltpu.CompilerParams(
            dimension_semantics=("parallel",),
            vmem_limit_bytes=_VMEM_LIMIT),
    )(y5, affine5)


def ring_embedding_forward(x, params, n_points, *,
                           matmul_dtype=jnp.float32,
                           tile_rows=_DEFAULT_TILE_ROWS):
    """x: (batch, n_rings, n_points, n_point_features) float32."""
    batch, n_rings, p, c0 = x.shape
    assert p == n_points
    m = batch * n_rings * p
    rings_total = batch * n_rings
    x2 = x.reshape(m, c0).astype(jnp.float32)

    tm = _pick_tile(m, tile_rows, 8)

    # conv1 (bias dropped: no-op before training-mode BN) + bn1 partial stats
    y1, s1 = _layer_call(x2, params["w1"], None, None, tm, matmul_dtype)
    a1 = _finalize_bn(s1, m, tm, params["g1"], params["be1"])
    # bn1+relu (folded) -> conv2 + bn2 stats
    y2, s2 = _layer_call(y1, params["w2"], a1, None, tm, matmul_dtype)
    a2 = _finalize_bn(s2, m, tm, params["g2"], params["be2"])
    # bn2+relu -> conv3 (+bias: per_point output is taken before bn3) + bn3 stats
    y3, s3 = _layer_call(y2, params["w3"], a2, params["b3"], tm, matmul_dtype)
    a3 = _finalize_bn(s3, m, tm, params["g3"], params["be3"])
    # bn3+relu -> conv4 + bn4 stats
    y4, s4 = _layer_call(y3, params["w4"], a3, None, tm, matmul_dtype)
    a4 = _finalize_bn(s4, m, tm, params["g4"], params["be4"])
    # bn4+relu -> conv5 + bn5 stats
    y5, s5 = _layer_call(y4, params["w5"], a4, None, tm, matmul_dtype)
    a5 = _finalize_bn(s5, m, tm, params["g5"], params["be5"])

    # bn5+relu -> max over the points of each ring
    tr = _pick_tile(rings_total, max(8, tile_rows // max(n_points, 1)), 8)
    ring_max = _ring_max_call(y5, a5, rings_total, n_points, tr)

    d = params["w5"].shape[1]
    c_pp = params["w3"].shape[1]
    return (ring_max.reshape(batch, n_rings, d),
            y3.reshape(batch, n_rings, p, c_pp))


def init_params(key, d_ring_embedding, n_point_features, n_extracted_point_features):
    """Deterministic synthetic parameters (conv weights as (Cin, Cout) matmuls)."""
    dims = [
        (n_point_features, n_point_features),                      # conv1
        (n_point_features, n_extracted_point_features),            # conv2
        (n_extracted_point_features, n_extracted_point_features),  # conv3
        (n_extracted_point_features, 128),                         # conv4
        (128, d_ring_embedding),                                   # conv5
    ]
    params = {}
    keys = jax.random.split(key, 2 * len(dims))
    for i, (cin, cout) in enumerate(dims, start=1):
        kw, kb = keys[2 * (i - 1)], keys[2 * (i - 1) + 1]
        params[f"w{i}"] = (0.1 * jax.random.normal(kw, (cin, cout))).astype(jnp.float32)
        params[f"b{i}"] = (0.1 * jax.random.normal(kb, (1, cout))).astype(jnp.float32)
        params[f"g{i}"] = jnp.ones((1, cout), jnp.float32)   # BatchNorm gamma
        params[f"be{i}"] = jnp.zeros((1, cout), jnp.float32)  # BatchNorm beta
    return params


def _reference_forward(x, params, n_points, matmul_dtype=jnp.float32):
    """Pure-JAX reference mirroring the torch forward (training-mode BN, with biases)."""
    batch, n_rings, p, c0 = x.shape
    m = batch * n_rings * p
    h = x.reshape(m, c0)

    def mm(a, w):
        return jnp.dot(a.astype(matmul_dtype), w.astype(matmul_dtype),
                       preferred_element_type=jnp.float32)

    def bn_relu(h, g, b):
        mean = h.mean(axis=0, keepdims=True)
        var = ((h - mean) ** 2).mean(axis=0, keepdims=True)
        return jnp.maximum((h - mean) / jnp.sqrt(var + BN_EPS) * g + b, 0.0)

    h = mm(h, params["w1"]) + params["b1"]
    h = bn_relu(h, params["g1"], params["be1"])
    h = mm(h, params["w2"]) + params["b2"]
    h = bn_relu(h, params["g2"], params["be2"])
    h = mm(h, params["w3"]) + params["b3"]
    pp = h
    h = bn_relu(h, params["g3"], params["be3"])
    h = mm(h, params["w4"]) + params["b4"]
    h = bn_relu(h, params["g4"], params["be4"])
    h = mm(h, params["w5"]) + params["b5"]
    h = bn_relu(h, params["g5"], params["be5"])
    d = h.shape[1]
    ring_max = h.reshape(batch * n_rings, p, d).max(axis=1).reshape(batch, n_rings, d)
    return ring_max, pp.reshape(batch, n_rings, p, -1)


if __name__ == "__main__":
    d_ring_embedding = 32
    n_point_features = 4
    n_extracted_point_features = 16
    batch, n_rings, n_points = 2, 4, 16

    key = jax.random.PRNGKey(0)
    kx, kp = jax.random.split(key)
    x = jax.random.normal(
        kx, (batch, n_rings, n_points, n_point_features), dtype=jnp.float32)
    params = init_params(kp, d_ring_embedding, n_point_features,
                         n_extracted_point_features)

    # f32 MXU path: must match the f32 reference tightly (biases b1/b2/b4/b5 are
    # dropped in the kernels but present in the reference -> exact BN no-op).
    fwd = jax.jit(functools.partial(ring_embedding_forward, n_points=n_points))
    ring_max, per_point = fwd(x, params)
    jax.block_until_ready((ring_max, per_point))

    ref_max, ref_pp = _reference_forward(x, params, n_points)
    assert ring_max.shape == (batch, n_rings, d_ring_embedding)
    assert per_point.shape == (batch, n_rings, n_points, n_extracted_point_features)
    assert jnp.allclose(ring_max, ref_max, atol=1e-4, rtol=1e-4)
    assert jnp.allclose(per_point, ref_pp, atol=1e-4, rtol=1e-4)

    # bf16 MXU operands (full-rate MXU on v5e/v6e/v7x); BN math stays f32.
    fwd_bf16 = jax.jit(functools.partial(
        ring_embedding_forward, n_points=n_points, matmul_dtype=jnp.bfloat16))
    rm16, pp16 = fwd_bf16(x, params)
    jax.block_until_ready((rm16, pp16))
    ref_max16, ref_pp16 = _reference_forward(x, params, n_points,
                                             matmul_dtype=jnp.bfloat16)
    assert jnp.allclose(rm16, ref_max16, atol=2e-2, rtol=2e-2)
    assert jnp.allclose(pp16, ref_pp16, atol=2e-2, rtol=2e-2)

    print("KERNEL_OK")
</pallas_src>

<mosaic_0001>
module attributes {stable_mosaic.version = 11 : i64} {
  func.func @_layer_kernel(%arg0: i32, %arg1: memref<128x4xf32, #tpu.memory_space<vmem>>, %arg2: memref<4x4xf32, #tpu.memory_space<vmem>>, %arg3: memref<128x4xf32, #tpu.memory_space<vmem>>, %arg4: memref<1x2x4xf32, #tpu.memory_space<vmem>>) attributes {dimension_semantics = [#tpu.dimension_semantics<parallel>], iteration_bounds = array<i64: 1>, scalar_prefetch = 0 : i64, scratch_operands = 0 : i64, tpu.core_type = #tpu.core_type<tc>, window_params = [{transform_indices = @transform_0, window_bounds = array<i64: 128, 4>}, {pipeline_mode = #tpu.pipeline_mode<synchronous>, transform_indices = @transform_1, window_bounds = array<i64: 4, 4>}, {transform_indices = @transform_2, window_bounds = array<i64: 128, 4>}, {transform_indices = @transform_3, window_bounds = array<i64: 1, 2, 4>}]} {
    %c0 = arith.constant 0 : index
    %c0_0 = arith.constant 0 : index
    %0 = vector.load %arg1[%c0, %c0_0] : memref<128x4xf32, #tpu.memory_space<vmem>>, vector<128x4xf32>
    %c0_1 = arith.constant 0 : index
    %c0_2 = arith.constant 0 : index
    %1 = vector.load %arg2[%c0_1, %c0_2] : memref<4x4xf32, #tpu.memory_space<vmem>>, vector<4x4xf32>
    %cst = arith.constant dense<0.000000e+00> : vector<128x4xf32>
    %2 = tpu.matmul %0, %1, %cst {dimension_numbers = #tpu.dot_dimension_numbers<[1], [0], [0], [1], [0, 0, 1, 1], [], []>} : vector<128x4xf32>, vector<4x4xf32>, vector<128x4xf32> -> vector<128x4xf32>
    %c0_3 = arith.constant 0 : index
    %c0_4 = arith.constant 0 : index
    %3 = vector.load %arg3[%c0_3, %c0_4] : memref<128x4xf32, #tpu.memory_space<vmem>>, vector<128x4xf32>
    tpu.vector_store %arg3[%c0_3, %c0_4], %2 {strides = array<i32>} : memref<128x4xf32, #tpu.memory_space<vmem>>, vector<128x4xf32>,
    %cst_5 = arith.constant dense<0.000000e+00> : vector<4xf32>
    %4 = vector.multi_reduction <add>, %2, %cst_5 [0] : vector<128x4xf32> to vector<4xf32>
    %5 = vector.shape_cast %4 : vector<4xf32> to vector<1x4xf32>
    %cst_6 = arith.constant 7.812500e-03 : f32
    %6 = vector.broadcast %cst_6 : f32 to vector<1x4xf32>
    %7 = arith.mulf %5, %6 : vector<1x4xf32>
    %8 = vector.broadcast %7 : vector<1x4xf32> to vector<128x4xf32>
    %9 = arith.subf %2, %8 : vector<128x4xf32>
    %c0_7 = arith.constant 0 : index
    %c0_8 = arith.constant 0 : index
    %c0_9 = arith.constant 0 : index
    %10 = vector.load %arg4[%c0_7, %c0_8, %c0_9] : memref<1x2x4xf32, #tpu.memory_space<vmem>>, vector<1x1x4xf32>
    %11 = vector.shape_cast %10 : vector<1x1x4xf32> to vector<1x4xf32>
    %12 = vector.shape_cast %5 : vector<1x4xf32> to vector<1x1x4xf32>
    tpu.vector_store %arg4[%c0_7, %c0_8, %c0_9], %12 {strides = array<i32>} : memref<1x2x4xf32, #tpu.memory_space<vmem>>, vector<1x1x4xf32>,
    %13 = arith.mulf %9, %9 : vector<128x4xf32>
    %cst_10 = arith.constant dense<0.000000e+00> : vector<4xf32>
    %14 = vector.multi_reduction <add>, %13, %cst_10 [0] : vector<128x4xf32> to vector<4xf32>
    %15 = vector.shape_cast %14 : vector<4xf32> to vector<1x4xf32>
    %c0_11 = arith.constant 0 : index
    %c1 = arith.constant 1 : index
    %c0_12 = arith.constant 0 : index
    %16 = vector.load %arg4[%c0_11, %c1, %c0_12] : memref<1x2x4xf32, #tpu.memory_space<vmem>>, vector<1x1x4xf32>
    %17 = vector.shape_cast %16 : vector<1x1x4xf32> to vector<1x4xf32>
    %18 = vector.shape_cast %15 : vector<1x4xf32> to vector<1x1x4xf32>
    tpu.vector_store %arg4[%c0_11, %c1, %c0_12], %18 {strides = array<i32>} : memref<1x2x4xf32, #tpu.memory_space<vmem>>, vector<1x1x4xf32>,
    return
  }
  func.func @transform_0(%arg0: i32) -> (i32, i32) {
    %c0_i32 = arith.constant 0 : i32
    %c0_i32_0 = arith.constant 0 : i32
    return %arg0, %c0_i32 : i32, i32
  }
  func.func @transform_1(%arg0: i32) -> (i32, i32) {
    %c0_i32 = arith.constant 0 : i32
    %c0_i32_0 = arith.constant 0 : i32
    %c0_i32_1 = arith.constant 0 : i32
    return %c0_i32, %c0_i32_0 : i32, i32
  }
  func.func @transform_2(%arg0: i32) -> (i32, i32) {
    %c0_i32 = arith.constant 0 : i32
    %c0_i32_0 = arith.constant 0 : i32
    return %arg0, %c0_i32 : i32, i32
  }
  func.func @transform_3(%arg0: i32) -> (i32, i32, i32) {
    %c0_i32 = arith.constant 0 : i32
    %c0_i32_0 = arith.constant 0 : i32
    %c0_i32_1 = arith.constant 0 : i32
    return %arg0, %c0_i32, %c0_i32_0 : i32, i32, i32
  }
}

module attributes {stable_mosaic.version = 11 : i64} {
  func.func @_layer_kernel(%arg0: i32, %arg1: memref<128x4xf32, #tpu.memory_space<vmem>>, %arg2: memref<2x4xf32, #tpu.memory_space<vmem>>, %arg3: memref<4x16xf32, #tpu.memory_space<vmem>>, %arg4: memref<128x16xf32, #tpu.memory_space<vmem>>, %arg5: memref<1x2x16xf32, #tpu.memory_space<vmem>>) attributes {dimension_semantics = [#tpu.dimension_semantics<parallel>], iteration_bounds = array<i64: 1>, scalar_prefetch = 0 : i64, scratch_operands = 0 : i64, tpu.core_type = #tpu.core_type<tc>, window_params = [{transform_indices = @transform_0, window_bounds = array<i64: 128, 4>}, {pipeline_mode = #tpu.pipeline_mode<synchronous>, transform_indices = @transform_1, window_bounds = array<i64: 2, 4>}, {pipeline_mode = #tpu.pipeline_mode<synchronous>, transform_indices = @transform_2, window_bounds = array<i64: 4, 16>}, {transform_indices = @transform_3, window_bounds = array<i64: 128, 16>}, {transform_indices = @transform_4, window_bounds = array<i64: 1, 2, 16>}]} {
    %c0 = arith.constant 0 : index
    %c0_0 = arith.constant 0 : index
    %0 = vector.load %arg1[%c0, %c0_0] : memref<128x4xf32, #tpu.memory_space<vmem>>, vector<128x4xf32>
    %c0_1 = arith.constant 0 : index
    %c0_2 = arith.constant 0 : index
    %1 = vector.load %arg2[%c0_1, %c0_2] : memref<2x4xf32, #tpu.memory_space<vmem>>, vector<1x4xf32>
    %2 = vector.broadcast %1 : vector<1x4xf32> to vector<128x4xf32>
    %3 = arith.mulf %0, %2 : vector<128x4xf32>
    %c1 = arith.constant 1 : index
    %c0_3 = arith.constant 0 : index
    %4 = vector.load %arg2[%c1, %c0_3] : memref<2x4xf32, #tpu.memory_space<vmem>>, vector<1x4xf32>
    %5 = vector.broadcast %4 : vector<1x4xf32> to vector<128x4xf32>
    %6 = arith.addf %3, %5 : vector<128x4xf32>
    %cst = arith.constant 0.000000e+00 : f32
    %7 = vector.broadcast %cst : f32 to vector<128x4xf32>
    %8 = arith.maximumf %6, %7 : vector<128x4xf32>
    %c0_4 = arith.constant 0 : index
    %c0_5 = arith.constant 0 : index
    %9 = vector.load %arg3[%c0_4, %c0_5] : memref<4x16xf32, #tpu.memory_space<vmem>>, vector<4x16xf32>
    %cst_6 = arith.constant dense<0.000000e+00> : vector<128x16xf32>
    %10 = tpu.matmul %8, %9, %cst_6 {dimension_numbers = #tpu.dot_dimension_numbers<[1], [0], [0], [1], [0, 0, 1, 1], [], []>} : vector<128x4xf32>, vector<4x16xf32>, vector<128x16xf32> -> vector<128x16xf32>
    %c0_7 = arith.constant 0 : index
    %c0_8 = arith.constant 0 : index
    %11 = vector.load %arg4[%c0_7, %c0_8] : memref<128x16xf32, #tpu.memory_space<vmem>>, vector<128x16xf32>
    tpu.vector_store %arg4[%c0_7, %c0_8], %10 {strides = array<i32>} : memref<128x16xf32, #tpu.memory_space<vmem>>, vector<128x16xf32>,
    %cst_9 = arith.constant dense<0.000000e+00> : vector<16xf32>
    %12 = vector.multi_reduction <add>, %10, %cst_9 [0] : vector<128x16xf32> to vector<16xf32>
    %13 = vector.shape_cast %12 : vector<16xf32> to vector<1x16xf32>
    %cst_10 = arith.constant 7.812500e-03 : f32
    %14 = vector.broadcast %cst_10 : f32 to vector<1x16xf32>
    %15 = arith.mulf %13, %14 : vector<1x16xf32>
    %16 = vector.broadcast %15 : vector<1x16xf32> to vector<128x16xf32>
    %17 = arith.subf %10, %16 : vector<128x16xf32>
    %c0_11 = arith.constant 0 : index
    %c0_12 = arith.constant 0 : index
    %c0_13 = arith.constant 0 : index
    %18 = vector.load %arg5[%c0_11, %c0_12, %c0_13] : memref<1x2x16xf32, #tpu.memory_space<vmem>>, vector<1x1x16xf32>
    %19 = vector.shape_cast %18 : vector<1x1x16xf32> to vector<1x16xf32>
    %20 = vector.shape_cast %13 : vector<1x16xf32> to vector<1x1x16xf32>
    tpu.vector_store %arg5[%c0_11, %c0_12, %c0_13], %20 {strides = array<i32>} : memref<1x2x16xf32, #tpu.memory_space<vmem>>, vector<1x1x16xf32>,
    %21 = arith.mulf %17, %17 : vector<128x16xf32>
    %cst_14 = arith.constant dense<0.000000e+00> : vector<16xf32>
    %22 = vector.multi_reduction <add>, %21, %cst_14 [0] : vector<128x16xf32> to vector<16xf32>
    %23 = vector.shape_cast %22 : vector<16xf32> to vector<1x16xf32>
    %c0_15 = arith.constant 0 : index
    %c1_16 = arith.constant 1 : index
    %c0_17 = arith.constant 0 : index
    %24 = vector.load %arg5[%c0_15, %c1_16, %c0_17] : memref<1x2x16xf32, #tpu.memory_space<vmem>>, vector<1x1x16xf32>
    %25 = vector.shape_cast %24 : vector<1x1x16xf32> to vector<1x16xf32>
    %26 = vector.shape_cast %23 : vector<1x16xf32> to vector<1x1x16xf32>
    tpu.vector_store %arg5[%c0_15, %c1_16, %c0_17], %26 {strides = array<i32>} : memref<1x2x16xf32, #tpu.memory_space<vmem>>, vector<1x1x16xf32>,
    return
  }
  func.func @transform_0(%arg0: i32) -> (i32, i32) {
    %c0_i32 = arith.constant 0 : i32
    %c0_i32_0 = arith.constant 0 : i32
    return %arg0, %c0_i32 : i32, i32
  }
  func.func @transform_1(%arg0: i32) -> (i32, i32) {
    %c0_i32 = arith.constant 0 : i32
    %c0_i32_0 = arith.constant 0 : i32
    %c0_i32_1 = arith.constant 0 : i32
    return %c0_i32, %c0_i32_0 : i32, i32
  }
  func.func @transform_2(%arg0: i32) -> (i32, i32) {
    %c0_i32 = arith.constant 0 : i32
    %c0_i32_0 = arith.constant 0 : i32
    %c0_i32_1 = arith.constant 0 : i32
    return %c0_i32, %c0_i32_0 : i32, i32
  }
  func.func @transform_3(%arg0: i32) -> (i32, i32) {
    %c0_i32 = arith.constant 0 : i32
    %c0_i32_0 = arith.constant 0 : i32
    return %arg0, %c0_i32 : i32, i32
  }
  func.func @transform_4(%arg0: i32) -> (i32, i32, i32) {
    %c0_i32 = arith.constant 0 : i32
    %c0_i32_0 = arith.constant 0 : i32
    %c0_i32_1 = arith.constant 0 : i32
    return %arg0, %c0_i32, %c0_i32_0 : i32, i32, i32
  }
}

module attributes {stable_mosaic.version = 11 : i64} {
  func.func @_layer_kernel(%arg0: i32, %arg1: memref<128x16xf32, #tpu.memory_space<vmem>>, %arg2: memref<2x16xf32, #tpu.memory_space<vmem>>, %arg3: memref<16x16xf32, #tpu.memory_space<vmem>>, %arg4: memref<1x16xf32, #tpu.memory_space<vmem>>, %arg5: memref<128x16xf32, #tpu.memory_space<vmem>>, %arg6: memref<1x2x16xf32, #tpu.memory_space<vmem>>) attributes {dimension_semantics = [#tpu.dimension_semantics<parallel>], iteration_bounds = array<i64: 1>, scalar_prefetch = 0 : i64, scratch_operands = 0 : i64, tpu.core_type = #tpu.core_type<tc>, window_params = [{transform_indices = @transform_0, window_bounds = array<i64: 128, 16>}, {pipeline_mode = #tpu.pipeline_mode<synchronous>, transform_indices = @transform_1, window_bounds = array<i64: 2, 16>}, {pipeline_mode = #tpu.pipeline_mode<synchronous>, transform_indices = @transform_2, window_bounds = array<i64: 16, 16>}, {pipeline_mode = #tpu.pipeline_mode<synchronous>, transform_indices = @transform_3, window_bounds = array<i64: 1, 16>}, {transform_indices = @transform_4, window_bounds = array<i64: 128, 16>}, {transform_indices = @transform_5, window_bounds = array<i64: 1, 2, 16>}]} {
    %c0 = arith.constant 0 : index
    %c0_0 = arith.constant 0 : index
    %0 = vector.load %arg1[%c0, %c0_0] : memref<128x16xf32, #tpu.memory_space<vmem>>, vector<128x16xf32>
    %c0_1 = arith.constant 0 : index
    %c0_2 = arith.constant 0 : index
    %1 = vector.load %arg2[%c0_1, %c0_2] : memref<2x16xf32, #tpu.memory_space<vmem>>, vector<1x16xf32>
    %2 = vector.broadcast %1 : vector<1x16xf32> to vector<128x16xf32>
    %3 = arith.mulf %0, %2 : vector<128x16xf32>
    %c1 = arith.constant 1 : index
    %c0_3 = arith.constant 0 : index
    %4 = vector.load %arg2[%c1, %c0_3] : memref<2x16xf32, #tpu.memory_space<vmem>>, vector<1x16xf32>
    %5 = vector.broadcast %4 : vector<1x16xf32> to vector<128x16xf32>
    %6 = arith.addf %3, %5 : vector<128x16xf32>
    %cst = arith.constant 0.000000e+00 : f32
    %7 = vector.broadcast %cst : f32 to vector<128x16xf32>
    %8 = arith.maximumf %6, %7 : vector<128x16xf32>
    %c0_4 = arith.constant 0 : index
    %c0_5 = arith.constant 0 : index
    %9 = vector.load %arg3[%c0_4, %c0_5] : memref<16x16xf32, #tpu.memory_space<vmem>>, vector<16x16xf32>
    %cst_6 = arith.constant dense<0.000000e+00> : vector<128x16xf32>
    %10 = tpu.matmul %8, %9, %cst_6 {dimension_numbers = #tpu.dot_dimension_numbers<[1], [0], [0], [1], [0, 0, 1, 1], [], []>} : vector<128x16xf32>, vector<16x16xf32>, vector<128x16xf32> -> vector<128x16xf32>
    %c0_7 = arith.constant 0 : index
    %c0_8 = arith.constant 0 : index
    %11 = vector.load %arg4[%c0_7, %c0_8] : memref<1x16xf32, #tpu.memory_space<vmem>>, vector<1x16xf32>
    %12 = vector.broadcast %11 : vector<1x16xf32> to vector<128x16xf32>
    %13 = arith.addf %10, %12 : vector<128x16xf32>
    %c0_9 = arith.constant 0 : index
    %c0_10 = arith.constant 0 : index
    %14 = vector.load %arg5[%c0_9, %c0_10] : memref<128x16xf32, #tpu.memory_space<vmem>>, vector<128x16xf32>
    tpu.vector_store %arg5[%c0_9, %c0_10], %13 {strides = array<i32>} : memref<128x16xf32, #tpu.memory_space<vmem>>, vector<128x16xf32>,
    %cst_11 = arith.constant dense<0.000000e+00> : vector<16xf32>
    %15 = vector.multi_reduction <add>, %13, %cst_11 [0] : vector<128x16xf32> to vector<16xf32>
    %16 = vector.shape_cast %15 : vector<16xf32> to vector<1x16xf32>
    %cst_12 = arith.constant 7.812500e-03 : f32
    %17 = vector.broadcast %cst_12 : f32 to vector<1x16xf32>
    %18 = arith.mulf %16, %17 : vector<1x16xf32>
    %19 = vector.broadcast %18 : vector<1x16xf32> to vector<128x16xf32>
    %20 = arith.subf %13, %19 : vector<128x16xf32>
    %c0_13 = arith.constant 0 : index
    %c0_14 = arith.constant 0 : index
    %c0_15 = arith.constant 0 : index
    %21 = vector.load %arg6[%c0_13, %c0_14, %c0_15] : memref<1x2x16xf32, #tpu.memory_space<vmem>>, vector<1x1x16xf32>
    %22 = vector.shape_cast %21 : vector<1x1x16xf32> to vector<1x16xf32>
    %23 = vector.shape_cast %16 : vector<1x16xf32> to vector<1x1x16xf32>
    tpu.vector_store %arg6[%c0_13, %c0_14, %c0_15], %23 {strides = array<i32>} : memref<1x2x16xf32, #tpu.memory_space<vmem>>, vector<1x1x16xf32>,
    %24 = arith.mulf %20, %20 : vector<128x16xf32>
    %cst_16 = arith.constant dense<0.000000e+00> : vector<16xf32>
    %25 = vector.multi_reduction <add>, %24, %cst_16 [0] : vector<128x16xf32> to vector<16xf32>
    %26 = vector.shape_cast %25 : vector<16xf32> to vector<1x16xf32>
    %c0_17 = arith.constant 0 : index
    %c1_18 = arith.constant 1 : index
    %c0_19 = arith.constant 0 : index
    %27 = vector.load %arg6[%c0_17, %c1_18, %c0_19] : memref<1x2x16xf32, #tpu.memory_space<vmem>>, vector<1x1x16xf32>
    %28 = vector.shape_cast %27 : vector<1x1x16xf32> to vector<1x16xf32>
    %29 = vector.shape_cast %26 : vector<1x16xf32> to vector<1x1x16xf32>
    tpu.vector_store %arg6[%c0_17, %c1_18, %c0_19], %29 {strides = array<i32>} : memref<1x2x16xf32, #tpu.memory_space<vmem>>, vector<1x1x16xf32>,
    return
  }
  func.func @transform_0(%arg0: i32) -> (i32, i32) {
    %c0_i32 = arith.constant 0 : i32
    %c0_i32_0 = arith.constant 0 : i32
    return %arg0, %c0_i32 : i32, i32
  }
  func.func @transform_1(%arg0: i32) -> (i32, i32) {
    %c0_i32 = arith.constant 0 : i32
    %c0_i32_0 = arith.constant 0 : i32
    %c0_i32_1 = arith.constant 0 : i32
    return %c0_i32, %c0_i32_0 : i32, i32
  }
  func.func @transform_2(%arg0: i32) -> (i32, i32) {
    %c0_i32 = arith.constant 0 : i32
    %c0_i32_0 = arith.constant 0 : i32
    %c0_i32_1 = arith.constant 0 : i32
    return %c0_i32, %c0_i32_0 : i32, i32
  }
  func.func @transform_3(%arg0: i32) -> (i32, i32) {
    %c0_i32 = arith.constant 0 : i32
    %c0_i32_0 = arith.constant 0 : i32
    %c0_i32_1 = arith.constant 0 : i32
    return %c0_i32, %c0_i32_0 : i32, i32
  }
  func.func @transform_4(%arg0: i32) -> (i32, i32) {
    %c0_i32 = arith.constant 0 : i32
    %c0_i32_0 = arith.constant 0 : i32
    return %arg0, %c0_i32 : i32, i32
  }
  func.func @transform_5(%arg0: i32) -> (i32, i32, i32) {
    %c0_i32 = arith.constant 0 : i32
    %c0_i32_0 = arith.constant 0 : i32
    %c0_i32_1 = arith.constant 0 : i32
    return %arg0, %c0_i32, %c0_i32_0 : i32, i32, i32
  }
}

module attributes {stable_mosaic.version = 11 : i64} {
  func.func @_layer_kernel(%arg0: i32, %arg1: memref<128x16xf32, #tpu.memory_space<vmem>>, %arg2: memref<2x16xf32, #tpu.memory_space<vmem>>, %arg3: memref<16x128xf32, #tpu.memory_space<vmem>>, %arg4: memref<128x128xf32, #tpu.memory_space<vmem>>, %arg5: memref<1x2x128xf32, #tpu.memory_space<vmem>>) attributes {dimension_semantics = [#tpu.dimension_semantics<parallel>], iteration_bounds = array<i64: 1>, scalar_prefetch = 0 : i64, scratch_operands = 0 : i64, tpu.core_type = #tpu.core_type<tc>, window_params = [{transform_indices = @transform_0, window_bounds = array<i64: 128, 16>}, {pipeline_mode = #tpu.pipeline_mode<synchronous>, transform_indices = @transform_1, window_bounds = array<i64: 2, 16>}, {pipeline_mode = #tpu.pipeline_mode<synchronous>, transform_indices = @transform_2, window_bounds = array<i64: 16, 128>}, {transform_indices = @transform_3, window_bounds = array<i64: 128, 128>}, {transform_indices = @transform_4, window_bounds = array<i64: 1, 2, 128>}]} {
    %c0 = arith.constant 0 : index
    %c0_0 = arith.constant 0 : index
    %0 = vector.load %arg1[%c0, %c0_0] : memref<128x16xf32, #tpu.memory_space<vmem>>, vector<128x16xf32>
    %c0_1 = arith.constant 0 : index
    %c0_2 = arith.constant 0 : index
    %1 = vector.load %arg2[%c0_1, %c0_2] : memref<2x16xf32, #tpu.memory_space<vmem>>, vector<1x16xf32>
    %2 = vector.broadcast %1 : vector<1x16xf32> to vector<128x16xf32>
    %3 = arith.mulf %0, %2 : vector<128x16xf32>
    %c1 = arith.constant 1 : index
    %c0_3 = arith.constant 0 : index
    %4 = vector.load %arg2[%c1, %c0_3] : memref<2x16xf32, #tpu.memory_space<vmem>>, vector<1x16xf32>
    %5 = vector.broadcast %4 : vector<1x16xf32> to vector<128x16xf32>
    %6 = arith.addf %3, %5 : vector<128x16xf32>
    %cst = arith.constant 0.000000e+00 : f32
    %7 = vector.broadcast %cst : f32 to vector<128x16xf32>
    %8 = arith.maximumf %6, %7 : vector<128x16xf32>
    %c0_4 = arith.constant 0 : index
    %c0_5 = arith.constant 0 : index
    %9 = vector.load %arg3[%c0_4, %c0_5] : memref<16x128xf32, #tpu.memory_space<vmem>>, vector<16x128xf32>
    %cst_6 = arith.constant dense<0.000000e+00> : vector<128x128xf32>
    %10 = tpu.matmul %8, %9, %cst_6 {dimension_numbers = #tpu.dot_dimension_numbers<[1], [0], [0], [1], [0, 0, 1, 1], [], []>} : vector<128x16xf32>, vector<16x128xf32>, vector<128x128xf32> -> vector<128x128xf32>
    %c0_7 = arith.constant 0 : index
    %c0_8 = arith.constant 0 : index
    %11 = vector.load %arg4[%c0_7, %c0_8] : memref<128x128xf32, #tpu.memory_space<vmem>>, vector<128x128xf32>
    tpu.vector_store %arg4[%c0_7, %c0_8], %10 {strides = array<i32>} : memref<128x128xf32, #tpu.memory_space<vmem>>, vector<128x128xf32>,
    %cst_9 = arith.constant dense<0.000000e+00> : vector<128xf32>
    %12 = vector.multi_reduction <add>, %10, %cst_9 [0] : vector<128x128xf32> to vector<128xf32>
    %13 = vector.shape_cast %12 : vector<128xf32> to vector<1x128xf32>
    %cst_10 = arith.constant 7.812500e-03 : f32
    %14 = vector.broadcast %cst_10 : f32 to vector<1x128xf32>
    %15 = arith.mulf %13, %14 : vector<1x128xf32>
    %16 = vector.broadcast %15 : vector<1x128xf32> to vector<128x128xf32>
    %17 = arith.subf %10, %16 : vector<128x128xf32>
    %c0_11 = arith.constant 0 : index
    %c0_12 = arith.constant 0 : index
    %c0_13 = arith.constant 0 : index
    %18 = vector.load %arg5[%c0_11, %c0_12, %c0_13] : memref<1x2x128xf32, #tpu.memory_space<vmem>>, vector<1x1x128xf32>
    %19 = vector.shape_cast %18 : vector<1x1x128xf32> to vector<1x128xf32>
    %20 = vector.shape_cast %13 : vector<1x128xf32> to vector<1x1x128xf32>
    tpu.vector_store %arg5[%c0_11, %c0_12, %c0_13], %20 {strides = array<i32>} : memref<1x2x128xf32, #tpu.memory_space<vmem>>, vector<1x1x128xf32>,
    %21 = arith.mulf %17, %17 : vector<128x128xf32>
    %cst_14 = arith.constant dense<0.000000e+00> : vector<128xf32>
    %22 = vector.multi_reduction <add>, %21, %cst_14 [0] : vector<128x128xf32> to vector<128xf32>
    %23 = vector.shape_cast %22 : vector<128xf32> to vector<1x128xf32>
    %c0_15 = arith.constant 0 : index
    %c1_16 = arith.constant 1 : index
    %c0_17 = arith.constant 0 : index
    %24 = vector.load %arg5[%c0_15, %c1_16, %c0_17] : memref<1x2x128xf32, #tpu.memory_space<vmem>>, vector<1x1x128xf32>
    %25 = vector.shape_cast %24 : vector<1x1x128xf32> to vector<1x128xf32>
    %26 = vector.shape_cast %23 : vector<1x128xf32> to vector<1x1x128xf32>
    tpu.vector_store %arg5[%c0_15, %c1_16, %c0_17], %26 {strides = array<i32>} : memref<1x2x128xf32, #tpu.memory_space<vmem>>, vector<1x1x128xf32>,
    return
  }
  func.func @transform_0(%arg0: i32) -> (i32, i32) {
    %c0_i32 = arith.constant 0 : i32
    %c0_i32_0 = arith.constant 0 : i32
    return %arg0, %c0_i32 : i32, i32
  }
  func.func @transform_1(%arg0: i32) -> (i32, i32) {
    %c0_i32 = arith.constant 0 : i32
    %c0_i32_0 = arith.constant 0 : i32
    %c0_i32_1 = arith.constant 0 : i32
    return %c0_i32, %c0_i32_0 : i32, i32
  }
  func.func @transform_2(%arg0: i32) -> (i32, i32) {
    %c0_i32 = arith.constant 0 : i32
    %c0_i32_0 = arith.constant 0 : i32
    %c0_i32_1 = arith.constant 0 : i32
    return %c0_i32, %c0_i32_0 : i32, i32
  }
  func.func @transform_3(%arg0: i32) -> (i32, i32) {
    %c0_i32 = arith.constant 0 : i32
    %c0_i32_0 = arith.constant 0 : i32
    return %arg0, %c0_i32 : i32, i32
  }
  func.func @transform_4(%arg0: i32) -> (i32, i32, i32) {
    %c0_i32 = arith.constant 0 : i32
    %c0_i32_0 = arith.constant 0 : i32
    %c0_i32_1 = arith.constant 0 : i32
    return %arg0, %c0_i32, %c0_i32_0 : i32, i32, i32
  }
}

module attributes {stable_mosaic.version = 11 : i64} {
  func.func @_layer_kernel(%arg0: i32, %arg1: memref<128x128xf32, #tpu.memory_space<vmem>>, %arg2: memref<2x128xf32, #tpu.memory_space<vmem>>, %arg3: memref<128x32xf32, #tpu.memory_space<vmem>>, %arg4: memref<128x32xf32, #tpu.memory_space<vmem>>, %arg5: memref<1x2x32xf32, #tpu.memory_space<vmem>>) attributes {dimension_semantics = [#tpu.dimension_semantics<parallel>], iteration_bounds = array<i64: 1>, scalar_prefetch = 0 : i64, scratch_operands = 0 : i64, tpu.core_type = #tpu.core_type<tc>, window_params = [{transform_indices = @transform_0, window_bounds = array<i64: 128, 128>}, {pipeline_mode = #tpu.pipeline_mode<synchronous>, transform_indices = @transform_1, window_bounds = array<i64: 2, 128>}, {pipeline_mode = #tpu.pipeline_mode<synchronous>, transform_indices = @transform_2, window_bounds = array<i64: 128, 32>}, {transform_indices = @transform_3, window_bounds = array<i64: 128, 32>}, {transform_indices = @transform_4, window_bounds = array<i64: 1, 2, 32>}]} {
    %c0 = arith.constant 0 : index
    %c0_0 = arith.constant 0 : index
    %0 = vector.load %arg1[%c0, %c0_0] : memref<128x128xf32, #tpu.memory_space<vmem>>, vector<128x128xf32>
    %c0_1 = arith.constant 0 : index
    %c0_2 = arith.constant 0 : index
    %1 = vector.load %arg2[%c0_1, %c0_2] : memref<2x128xf32, #tpu.memory_space<vmem>>, vector<1x128xf32>
    %2 = vector.broadcast %1 : vector<1x128xf32> to vector<128x128xf32>
    %3 = arith.mulf %0, %2 : vector<128x128xf32>
    %c1 = arith.constant 1 : index
    %c0_3 = arith.constant 0 : index
    %4 = vector.load %arg2[%c1, %c0_3] : memref<2x128xf32, #tpu.memory_space<vmem>>, vector<1x128xf32>
    %5 = vector.broadcast %4 : vector<1x128xf32> to vector<128x128xf32>
    %6 = arith.addf %3, %5 : vector<128x128xf32>
    %cst = arith.constant 0.000000e+00 : f32
    %7 = vector.broadcast %cst : f32 to vector<128x128xf32>
    %8 = arith.maximumf %6, %7 : vector<128x128xf32>
    %c0_4 = arith.constant 0 : index
    %c0_5 = arith.constant 0 : index
    %9 = vector.load %arg3[%c0_4, %c0_5] : memref<128x32xf32, #tpu.memory_space<vmem>>, vector<128x32xf32>
    %cst_6 = arith.constant dense<0.000000e+00> : vector<128x32xf32>
    %10 = tpu.matmul %8, %9, %cst_6 {dimension_numbers = #tpu.dot_dimension_numbers<[1], [0], [0], [1], [0, 0, 1, 1], [], []>} : vector<128x128xf32>, vector<128x32xf32>, vector<128x32xf32> -> vector<128x32xf32>
    %c0_7 = arith.constant 0 : index
    %c0_8 = arith.constant 0 : index
    %11 = vector.load %arg4[%c0_7, %c0_8] : memref<128x32xf32, #tpu.memory_space<vmem>>, vector<128x32xf32>
    tpu.vector_store %arg4[%c0_7, %c0_8], %10 {strides = array<i32>} : memref<128x32xf32, #tpu.memory_space<vmem>>, vector<128x32xf32>,
    %cst_9 = arith.constant dense<0.000000e+00> : vector<32xf32>
    %12 = vector.multi_reduction <add>, %10, %cst_9 [0] : vector<128x32xf32> to vector<32xf32>
    %13 = vector.shape_cast %12 : vector<32xf32> to vector<1x32xf32>
    %cst_10 = arith.constant 7.812500e-03 : f32
    %14 = vector.broadcast %cst_10 : f32 to vector<1x32xf32>
    %15 = arith.mulf %13, %14 : vector<1x32xf32>
    %16 = vector.broadcast %15 : vector<1x32xf32> to vector<128x32xf32>
    %17 = arith.subf %10, %16 : vector<128x32xf32>
    %c0_11 = arith.constant 0 : index
    %c0_12 = arith.constant 0 : index
    %c0_13 = arith.constant 0 : index
    %18 = vector.load %arg5[%c0_11, %c0_12, %c0_13] : memref<1x2x32xf32, #tpu.memory_space<vmem>>, vector<1x1x32xf32>
    %19 = vector.shape_cast %18 : vector<1x1x32xf32> to vector<1x32xf32>
    %20 = vector.shape_cast %13 : vector<1x32xf32> to vector<1x1x32xf32>
    tpu.vector_store %arg5[%c0_11, %c0_12, %c0_13], %20 {strides = array<i32>} : memref<1x2x32xf32, #tpu.memory_space<vmem>>, vector<1x1x32xf32>,
    %21 = arith.mulf %17, %17 : vector<128x32xf32>
    %cst_14 = arith.constant dense<0.000000e+00> : vector<32xf32>
    %22 = vector.multi_reduction <add>, %21, %cst_14 [0] : vector<128x32xf32> to vector<32xf32>
    %23 = vector.shape_cast %22 : vector<32xf32> to vector<1x32xf32>
    %c0_15 = arith.constant 0 : index
    %c1_16 = arith.constant 1 : index
    %c0_17 = arith.constant 0 : index
    %24 = vector.load %arg5[%c0_15, %c1_16, %c0_17] : memref<1x2x32xf32, #tpu.memory_space<vmem>>, vector<1x1x32xf32>
    %25 = vector.shape_cast %24 : vector<1x1x32xf32> to vector<1x32xf32>
    %26 = vector.shape_cast %23 : vector<1x32xf32> to vector<1x1x32xf32>
    tpu.vector_store %arg5[%c0_15, %c1_16, %c0_17], %26 {strides = array<i32>} : memref<1x2x32xf32, #tpu.memory_space<vmem>>, vector<1x1x32xf32>,
    return
  }
  func.func @transform_0(%arg0: i32) -> (i32, i32) {
    %c0_i32 = arith.constant 0 : i32
    %c0_i32_0 = arith.constant 0 : i32
    return %arg0, %c0_i32 : i32, i32
  }
  func.func @transform_1(%arg0: i32) -> (i32, i32) {
    %c0_i32 = arith.constant 0 : i32
    %c0_i32_0 = arith.constant 0 : i32
    %c0_i32_1 = arith.constant 0 : i32
    return %c0_i32, %c0_i32_0 : i32, i32
  }
  func.func @transform_2(%arg0: i32) -> (i32, i32) {
    %c0_i32 = arith.constant 0 : i32
    %c0_i32_0 = arith.constant 0 : i32
    %c0_i32_1 = arith.constant 0 : i32
    return %c0_i32, %c0_i32_0 : i32, i32
  }
  func.func @transform_3(%arg0: i32) -> (i32, i32) {
    %c0_i32 = arith.constant 0 : i32
    %c0_i32_0 = arith.constant 0 : i32
    return %arg0, %c0_i32 : i32, i32
  }
  func.func @transform_4(%arg0: i32) -> (i32, i32, i32) {
    %c0_i32 = arith.constant 0 : i32
    %c0_i32_0 = arith.constant 0 : i32
    %c0_i32_1 = arith.constant 0 : i32
    return %arg0, %c0_i32, %c0_i32_0 : i32, i32, i32
  }
}

module attributes {stable_mosaic.version = 11 : i64} {
  func.func @_ring_max_kernel(%arg0: i32, %arg1: memref<128x32xf32, #tpu.memory_space<vmem>>, %arg2: memref<2x32xf32, #tpu.memory_space<vmem>>, %arg3: memref<8x32xf32, #tpu.memory_space<vmem>>) attributes {dimension_semantics = [#tpu.dimension_semantics<parallel>], iteration_bounds = array<i64: 1>, scalar_prefetch = 0 : i64, scratch_operands = 0 : i64, tpu.core_type = #tpu.core_type<tc>, window_params = [{transform_indices = @transform_0, window_bounds = array<i64: 128, 32>}, {pipeline_mode = #tpu.pipeline_mode<synchronous>, transform_indices = @transform_1, window_bounds = array<i64: 2, 32>}, {transform_indices = @transform_2, window_bounds = array<i64: 8, 32>}]} {
    %c0 = arith.constant 0 : index
    %c0_0 = arith.constant 0 : index
    %0 = vector.load %arg1[%c0, %c0_0] : memref<128x32xf32, #tpu.memory_space<vmem>>, vector<128x32xf32>
    %c0_1 = arith.constant 0 : index
    %c0_2 = arith.constant 0 : index
    %1 = vector.load %arg2[%c0_1, %c0_2] : memref<2x32xf32, #tpu.memory_space<vmem>>, vector<1x32xf32>
    %2 = vector.broadcast %1 : vector<1x32xf32> to vector<128x32xf32>
    %3 = arith.mulf %0, %2 : vector<128x32xf32>
    %c1 = arith.constant 1 : index
    %c0_3 = arith.constant 0 : index
    %4 = vector.load %arg2[%c1, %c0_3] : memref<2x32xf32, #tpu.memory_space<vmem>>, vector<1x32xf32>
    %5 = vector.broadcast %4 : vector<1x32xf32> to vector<128x32xf32>
    %6 = arith.addf %3, %5 : vector<128x32xf32>
    %cst = arith.constant 0.000000e+00 : f32
    %7 = vector.broadcast %cst : f32 to vector<128x32xf32>
    %8 = arith.maximumf %6, %7 : vector<128x32xf32>
    %9 = vector.shape_cast %8 : vector<128x32xf32> to vector<8x16x32xf32>
    %10 = vector.extract_strided_slice %9 {offsets = [0, 0, 0], sizes = [8, 8, 32], strides = [1, 1, 1]} : vector<8x16x32xf32> to vector<8x8x32xf32>
    %11 = vector.extract_strided_slice %9 {offsets = [0, 8, 0], sizes = [8, 8, 32], strides = [1, 1, 1]} : vector<8x16x32xf32> to vector<8x8x32xf32>
    %12 = arith.maximumf %10, %11 : vector<8x8x32xf32>
    %13 = vector.extract_strided_slice %12 {offsets = [0, 0, 0], sizes = [8, 4, 32], strides = [1, 1, 1]} : vector<8x8x32xf32> to vector<8x4x32xf32>
    %14 = vector.extract_strided_slice %12 {offsets = [0, 4, 0], sizes = [8, 4, 32], strides = [1, 1, 1]} : vector<8x8x32xf32> to vector<8x4x32xf32>
    %15 = arith.maximumf %13, %14 : vector<8x4x32xf32>
    %16 = vector.extract_strided_slice %15 {offsets = [0, 0, 0], sizes = [8, 2, 32], strides = [1, 1, 1]} : vector<8x4x32xf32> to vector<8x2x32xf32>
    %17 = vector.extract_strided_slice %15 {offsets = [0, 2, 0], sizes = [8, 2, 32], strides = [1, 1, 1]} : vector<8x4x32xf32> to vector<8x2x32xf32>
    %18 = arith.maximumf %16, %17 : vector<8x2x32xf32>
    %19 = vector.extract_strided_slice %18 {offsets = [0, 0, 0], sizes = [8, 1, 32], strides = [1, 1, 1]} : vector<8x2x32xf32> to vector<8x1x32xf32>
    %20 = vector.extract_strided_slice %18 {offsets = [0, 1, 0], sizes = [8, 1, 32], strides = [1, 1, 1]} : vector<8x2x32xf32> to vector<8x1x32xf32>
    %21 = arith.maximumf %19, %20 : vector<8x1x32xf32>
    %22 = vector.shape_cast %21 : vector<8x1x32xf32> to vector<8x32xf32>
    %c0_4 = arith.constant 0 : index
    %c0_5 = arith.constant 0 : index
    %23 = vector.load %arg3[%c0_4, %c0_5] : memref<8x32xf32, #tpu.memory_space<vmem>>, vector<8x32xf32>
    tpu.vector_store %arg3[%c0_4, %c0_5], %22 {strides = array<i32>} : memref<8x32xf32, #tpu.memory_space<vmem>>, vector<8x32xf32>,
    return
  }
  func.func @transform_0(%arg0: i32) -> (i32, i32) {
    %c0_i32 = arith.constant 0 : i32
    %c0_i32_0 = arith.constant 0 : i32
    return %arg0, %c0_i32 : i32, i32
  }
  func.func @transform_1(%arg0: i32) -> (i32, i32) {
    %c0_i32 = arith.constant 0 : i32
    %c0_i32_0 = arith.constant 0 : i32
    %c0_i32_1 = arith.constant 0 : i32
    return %c0_i32, %c0_i32_0 : i32, i32
  }
  func.func @transform_2(%arg0: i32) -> (i32, i32) {
    %c0_i32 = arith.constant 0 : i32
    %c0_i32_0 = arith.constant 0 : i32
    return %arg0, %c0_i32 : i32, i32
  }
}

</mosaic_0001>

<bundles_post_ra>
// kernel: ring_embedding_forward.6
= control target key start
LH: loop header
LB: loop body
LE: loop exit
PB: predicated region body
PF: predicated region fallthrough
CT: control target
= control target key end

     0   :  { %vm79_vm0 = vcmask 1043456   ;;  %vm30_vm1 = vcmask 31744   ;;  %vm218_vm2 = vcmask 24576   ;;  %s568_s1 = inlined_call_operand.vmem [shape: f32[4,4], index: 1, kind: input, shape index: {}]   ;;  %s569_s0 = inlined_call_operand.vmem [shape: f32[128,4], index: 0, kind: input, shape index: {}]   ;;  %s570_s2 = inlined_call_operand.vmem [shape: f32[128,4], index: 2, kind: output, shape index: {0}]   ;;  %s571_s3 = inlined_call_operand.vmem [shape: f32[1,2,4], index: 3, kind: output, shape index: {1}]  }
   0x1   :  { %v29_v0 = vld [vmem:[%s568_s1] sm:$0xf]  ;;  %v14_v5 = vld [vmem:[%s569_s0 + $0x8] sm:$0xff]  ;;  %v15_v9 = vld [vmem:[%s569_s0 + $0x10] sm:$0xff] }
   0x2   :  { %v13_v1 = vld [vmem:[%s569_s0] sm:$0xff]  ;;  %282 = vmatpush.msk.msra.mxu0 %vm79_vm0, %v29_v0  ;;  %299 = vmatpush.msk.msra.mxu1 %vm79_vm0, %v29_v0  ;;  %v18_v6 = vld [vmem:[%s569_s0 + $0x28] sm:$0xff]  ;;  %v19_v10 = vld [vmem:[%s569_s0 + $0x30] sm:$0xff] }
   0x3   :  { %v17_v2 = vld [vmem:[%s569_s0 + $0x20] sm:$0xff]  ;;  %283 = vmatmul.msk.f32.vlgmr.msra.gmra.mxu0 %vm30_vm1, %v13_v1  ;;  %300 = vmatpush.msk.msra.mxu2 %vm79_vm0, %v29_v0  ;;  %v22_v7 = vld [vmem:[%s569_s0 + $0x48] sm:$0xff]  ;;  %v23_v11 = vld [vmem:[%s569_s0 + $0x50] sm:$0xff] }
   0x4   :  { %v21_v3 = vld [vmem:[%s569_s0 + $0x40] sm:$0xff]  ;;  %287 = vmatmul.msk.f32.vlgmr.msra.gmra.mxu1 %vm30_vm1, %v17_v2  ;;  %301 = vmatpush.msk.msra.mxu3 %vm79_vm0, %v29_v0  ;;  %v26_v8 = vld [vmem:[%s569_s0 + $0x68] sm:$0xff]  ;;  %v27_v12 = vld [vmem:[%s569_s0 + $0x70] sm:$0xff] }
   0x5   :  { %v25_v4 = vld [vmem:[%s569_s0 + $0x60] sm:$0xff]  ;;  %291 = vmatmul.msk.f32.vlgmr.msra.gmra.mxu2 %vm30_vm1, %v21_v3  ;;  %v16_v13 = vld [vmem:[%s569_s0 + $0x18] sm:$0xff] }
   0x6   :  { %295 = vmatmul.msk.f32.vlgmr.msra.gmra.mxu3 %vm30_vm1, %v25_v4  ;;  %v20_v14 = vld [vmem:[%s569_s0 + $0x38] sm:$0xff] }
   0x7   :  { %v24_v15 = vld [vmem:[%s569_s0 + $0x58] sm:$0xff] }
   0x8   :  { %v28_v16 = vld [vmem:[%s569_s0 + $0x78] sm:$0xff] }
   0xb   :  { %284 = vmatmul.msk.f32.gmra.mxu0 %vm30_vm1, %v14_v5 }
   0xc   :  { %288 = vmatmul.msk.f32.gmra.mxu1 %vm30_vm1, %v18_v6 }
   0xd   :  { %292 = vmatmul.msk.f32.gmra.mxu2 %vm30_vm1, %v22_v7 }
   0xe   :  { %296 = vmatmul.msk.f32.gmra.mxu3 %vm30_vm1, %v26_v8 }
  0x13   :  { %285 = vmatmul.msk.f32.gmra.mxu0 %vm30_vm1, %v15_v9 }
  0x14   :  { %289 = vmatmul.msk.f32.gmra.mxu1 %vm30_vm1, %v19_v10 }
  0x15   :  { %293 = vmatmul.msk.f32.gmra.mxu2 %vm30_vm1, %v23_v11 }
  0x16   :  { %297 = vmatmul.msk.f32.gmra.mxu3 %vm30_vm1, %v27_v12 }
  0x1b   :  { %286 = vmatmul.msk.f32.gmra.mxu0 %vm30_vm1, %v16_v13 }
  0x1c   :  { %290 = vmatmul.msk.f32.gmra.mxu1 %vm30_vm1, %v20_v14 }
  0x1d   :  { %294 = vmatmul.msk.f32.gmra.mxu2 %vm30_vm1, %v24_v15 }
  0x1e   :  { %298 = vmatmul.msk.f32.gmra.mxu3 %vm30_vm1, %v28_v16 }
  0x80   :  { %v389_v17 = vpop.f32.mrf.mxu0 }
  0x81   :  { %v391_v18 = vpop.f32.mrf.mxu1  ;;  %148 = vst.msk [vmem:[%s570_s2] sm:$0xff] %vm30_vm1, %v389_v17  ;;  %v164_v28 = vsel %vm30_vm1, %v389_v17, 0.0 }
  0x82   :  { %152 = vst.msk [vmem:[%s570_s2 + $0x20] sm:$0xff] %vm30_vm1, %v391_v18  ;;  %v171_v38 = vsel %vm30_vm1, %v391_v18, 0.0 }
  0x88   :  { %v403_v19 = vpop.f32.mrf.mxu0  ;;  %v412_v21 = vpop.f32.mrf.mxu2 }
  0x89   :  { %v405_v20 = vpop.f32.mrf.mxu1  ;;  %149 = vst.msk [vmem:[%s570_s2 + $0x8] sm:$0xff] %vm30_vm1, %v403_v19  ;;  %v414_v22 = vpop.f32.mrf.mxu3  ;;  %v165_v27 = vsel %vm30_vm1, %v403_v19, 0.0  ;;  %v179_v48 = vsel %vm30_vm1, %v412_v21, 0.0 }
  0x8a   :  { %153 = vst.msk [vmem:[%s570_s2 + $0x28] sm:$0xff] %vm30_vm1, %v405_v20  ;;  %v166_v30 = vadd.f32 %v165_v27, %v164_v28  ;;  %v173_v40 = vsel %vm30_vm1, %v405_v20, 0.0  ;;  %v187_v56 = vsel %vm30_vm1, %v414_v22, 0.0 }
  0x8b   :  { %156 = vst.msk [vmem:[%s570_s2 + $0x40] sm:$0xff] %vm30_vm1, %v412_v21 }
  0x8c   :  { %160 = vst.msk [vmem:[%s570_s2 + $0x60] sm:$0xff] %vm30_vm1, %v414_v22 }
  0x90   :  { %v431_v23 = vpop.f32.mrf.mxu0  ;;  %v440_v25 = vpop.f32.mrf.mxu2 }
  0x91   :  { %v433_v24 = vpop.f32.mrf.mxu1  ;;  %150 = vst.msk [vmem:[%s570_s2 + $0x10] sm:$0xff] %vm30_vm1, %v431_v23  ;;  %v442_v26 = vpop.f32.mrf.mxu3  ;;  %v167_v29 = vsel %vm30_vm1, %v431_v23, 0.0  ;;  %v181_v50 = vsel %vm30_vm1, %v440_v25, 0.0 }
  0x92   :  { %154 = vst.msk [vmem:[%s570_s2 + $0x30] sm:$0xff] %vm30_vm1, %v433_v24  ;;  %v168_v31 = vadd.f32 %v167_v29, %v166_v30  ;;  %v175_v42 = vsel %vm30_vm1, %v433_v24, 0.0  ;;  %v189_v58 = vsel %vm30_vm1, %v442_v26, 0.0 }
  0x93   :  { %157 = vst.msk [vmem:[%s570_s2 + $0x48] sm:$0xff] %vm30_vm1, %v440_v25 }
  0x94   :  { %161 = vst.msk [vmem:[%s570_s2 + $0x68] sm:$0xff] %vm30_vm1, %v442_v26 }
  0x98   :  { %v109_v32 = vpop.f32.mrf.mxu0  ;;  %v472_v35 = vpop.f32.mrf.mxu2 }
  0x99   :  { %v465_v33 = vpop.f32.mrf.mxu1  ;;  %151 = vst.msk [vmem:[%s570_s2 + $0x18] sm:$0xff] %vm30_vm1, %v109_v32  ;;  %v169_v34 = vsel %vm30_vm1, %v109_v32, 0.0  ;;  %v474_v36 = vpop.f32.mrf.mxu3  ;;  %v183_v52 = vsel %vm30_vm1, %v472_v35, 0.0 }
  0x9a   :  { %v170_v37 = vadd.f32 %v169_v34, %v168_v31  ;;  %155 = vst.msk [vmem:[%s570_s2 + $0x38] sm:$0xff] %vm30_vm1, %v465_v33  ;;  %v177_v43 = vsel %vm30_vm1, %v465_v33, 0.0  ;;  %v191_v60 = vsel %vm30_vm1, %v474_v36, 0.0 }
  0x9b   :  { %158 = vst.msk [vmem:[%s570_s2 + $0x50] sm:$0xff] %vm30_vm1, %v472_v35 }
  0x9c   :  { %v172_v39 = vadd.f32 %v171_v38, %v170_v37  ;;  %162 = vst.msk [vmem:[%s570_s2 + $0x70] sm:$0xff] %vm30_vm1, %v474_v36 }
  0x9e   :  { %v174_v41 = vadd.f32 %v173_v40, %v172_v39 }
  0xa0   :  { %v176_v44 = vadd.f32 %v175_v42, %v174_v41  ;;  %v499_v45 = vpop.f32.mrf.mxu2 }
  0xa1   :  { %v501_v46 = vpop.f32.mrf.mxu3  ;;  %159 = vst.msk [vmem:[%s570_s2 + $0x58] sm:$0xff] %vm30_vm1, %v499_v45  ;;  %v185_v53 = vsel %vm30_vm1, %v499_v45, 0.0 }
  0xa2   :  { %v178_v47 = vadd.f32 %v177_v43, %v176_v44  ;;  %163 = vst.msk [vmem:[%s570_s2 + $0x78] sm:$0xff] %vm30_vm1, %v501_v46  ;;  %v193_v61 = vsel %vm30_vm1, %v501_v46, 0.0 }
  0xa4   :  { %v180_v49 = vadd.f32 %v179_v48, %v178_v47 }
  0xa6   :  { %v182_v51 = vadd.f32 %v181_v50, %v180_v49 }
  0xa8   :  { %v184_v54 = vadd.f32 %v183_v52, %v182_v51 }
  0xaa   :  { %v186_v55 = vadd.f32 %v185_v53, %v184_v54 }
  0xac   :  { %v188_v57 = vadd.f32 %v187_v56, %v186_v55 }
  0xae   :  { %v190_v59 = vadd.f32 %v189_v58, %v188_v57 }
  0xb0   :  { %v192_v62 = vadd.f32 %v191_v60, %v190_v59 }
  0xb2   :  { %v194_v63 = vadd.f32 %v193_v61, %v192_v62 }
  0xb4   :  { %v195_v0 = vrot.slane %v194_v63, 4 }
  0xb6   :  { %v196_v1 = vadd.f32 %v195_v0, %v194_v63 }
  0xb8   :  { %v197_v2 = vrot.slane %v196_v1, 2 }
  0xba   :  { %v198_v3 = vadd.f32 %v197_v2, %v196_v1 }
  0xbc   :  { %v199_v4 = vrot.slane %v198_v3, 1 }
  0xbe   :  { %v200_v5 = vadd.f32 %v199_v4, %v198_v3 }
  0xc0   :  { %v201_v6 = vmul.f32 0.0078125, %v200_v5  ;;  %219 = vst.msk [vmem:[%s571_s3] sm:$0x1] %vm218_vm2, %v200_v5 }
  0xc2   :  { %v202_v7 = vsub.f32 %v389_v17, %v201_v6  ;;  %v203_v8 = vsub.f32 %v403_v19, %v201_v6  ;;  %v204_v9 = vsub.f32 %v431_v23, %v201_v6  ;;  %v205_v10 = vsub.f32 %v109_v32, %v201_v6 }
  0xc3   :  { %v206_v13 = vsub.f32 %v391_v18, %v201_v6  ;;  %v207_v15 = vsub.f32 %v405_v20, %v201_v6  ;;  %v208_v17 = vsub.f32 %v433_v24, %v201_v6  ;;  %v209_v31 = vsub.f32 %v465_v33, %v201_v6 }
  0xc4   :  { %v220_v11 = vmul.f32 %v202_v7, %v202_v7  ;;  %v221_v12 = vmul.f32 %v203_v8, %v203_v8  ;;  %v222_v14 = vmul.f32 %v204_v9, %v204_v9  ;;  %v223_v16 = vmul.f32 %v205_v10, %v205_v10 }
  0xc5   :  { %v224_v30 = vmul.f32 %v206_v13, %v206_v13  ;;  %v225_v32 = vmul.f32 %v207_v15, %v207_v15  ;;  %v210_v20 = vsub.f32 %v412_v21, %v201_v6  ;;  %v226_v37 = vmul.f32 %v208_v17, %v208_v17 }
  0xc6   :  { %v236_v27 = vsel %vm30_vm1, %v220_v11, 0.0  ;;  %v237_v28 = vsel %vm30_vm1, %v221_v12, 0.0  ;;  %v239_v19 = vsel %vm30_vm1, %v222_v14, 0.0  ;;  %v241_v18 = vsel %vm30_vm1, %v223_v16, 0.0 }
  0xc7   :  { %v238_v29 = vadd.f32 %v237_v28, %v236_v27  ;;  %v243_v38 = vsel %vm30_vm1, %v224_v30, 0.0  ;;  %v211_v40 = vsub.f32 %v440_v25, %v201_v6  ;;  %v227_v41 = vmul.f32 %v209_v31, %v209_v31 }
  0xc8   :  { %v245_v24 = vsel %vm30_vm1, %v225_v32, 0.0  ;;  %v212_v43 = vsub.f32 %v472_v35, %v201_v6  ;;  %v228_v44 = vmul.f32 %v210_v20, %v210_v20  ;;  %v247_v33 = vsel %vm30_vm1, %v226_v37, 0.0 }
  0xc9   :  { %v240_v23 = vadd.f32 %v239_v19, %v238_v29  ;;  %v213_v48 = vsub.f32 %v499_v45, %v201_v6  ;;  %v229_v49 = vmul.f32 %v211_v40, %v211_v40  ;;  %v249_v21 = vsel %vm30_vm1, %v227_v41, 0.0 }
  0xca   :  { %v214_v51 = vsub.f32 %v414_v22, %v201_v6  ;;  %v230_v52 = vmul.f32 %v212_v43, %v212_v43  ;;  %v251_v25 = vsel %vm30_vm1, %v228_v44, 0.0  ;;  %v215_v54 = vsub.f32 %v442_v26, %v201_v6 }
  0xcb   :  { %v242_v34 = vadd.f32 %v241_v18, %v240_v23  ;;  %v231_v55 = vmul.f32 %v213_v48, %v213_v48  ;;  %v253_v35 = vsel %vm30_vm1, %v229_v49, 0.0  ;;  %v216_v57 = vsub.f32 %v474_v36, %v201_v6 }
  0xcc   :  { %v232_v58 = vmul.f32 %v214_v51, %v214_v51  ;;  %v255_v45 = vsel %vm30_vm1, %v230_v52, 0.0  ;;  %v217_v60 = vsub.f32 %v501_v46, %v201_v6  ;;  %v233_v61 = vmul.f32 %v215_v54, %v215_v54 }
  0xcd   :  { %v244_v39 = vadd.f32 %v243_v38, %v242_v34  ;;  %v257_v22 = vsel %vm30_vm1, %v231_v55, 0.0  ;;  %v234_v63 = vmul.f32 %v216_v57, %v216_v57 }
  0xce   :  { %v259_v0 = vsel %vm30_vm1, %v232_v58, 0.0  ;;  %v235_v1 = vmul.f32 %v217_v60, %v217_v60  ;;  %v261_v2 = vsel %vm30_vm1, %v233_v61, 0.0 }
  0xcf   :  { %v246_v42 = vadd.f32 %v245_v24, %v244_v39  ;;  %v263_v36 = vsel %vm30_vm1, %v234_v63, 0.0 }
  0xd0   :  { %v265_v5 = vsel %vm30_vm1, %v235_v1, 0.0 }
  0xd1   :  { %v248_v47 = vadd.f32 %v247_v33, %v246_v42 }
  0xd3   :  { %v250_v50 = vadd.f32 %v249_v21, %v248_v47 }
  0xd5   :  { %v252_v53 = vadd.f32 %v251_v25, %v250_v50 }
  0xd7   :  { %v254_v56 = vadd.f32 %v253_v35, %v252_v53 }
  0xd9   :  { %v256_v59 = vadd.f32 %v255_v45, %v254_v56 }
  0xdb   :  { %v258_v62 = vadd.f32 %v257_v22, %v256_v59 }
  0xdd   :  { %v260_v26 = vadd.f32 %v259_v0, %v258_v62 }
  0xdf   :  { %v262_v3 = vadd.f32 %v261_v2, %v260_v26 }
  0xe1   :  { %v264_v4 = vadd.f32 %v263_v36, %v262_v3 }
  0xe3   :  { %v266_v7 = vadd.f32 %v265_v5, %v264_v4 }
  0xe5   :  { %v267_v8 = vrot.slane %v266_v7, 4 }
  0xe7   :  { %v268_v46 = vadd.f32 %v267_v8, %v266_v7 }
  0xe9   :  { %v269_v6 = vrot.slane %v268_v46, 2 }
  0xeb   :  { %v270_v9 = vadd.f32 %v269_v6, %v268_v46 }
  0xed   :  { %v271_v10 = vrot.slane %v270_v9, 1 }
  0xef   :  { %v272_v11 = vadd.f32 %v271_v10, %v270_v9 }
  0xf1   :  { %273 = vst.msk [vmem:[%s571_s3 + $0x1] sm:$0x1] %vm218_vm2, %v272_v11 }

// kernel: ring_embedding_forward.7
= control target key start
LH: loop header
LB: loop body
LE: loop exit
PB: predicated region body
PF: predicated region fallthrough
CT: control target
= control target key end

     0   :  { %vm134_vm0 = vcmask 1043456   ;;  %vm85_vm1 = vcmask 31744   ;;  %vm203_vm2 = vcmask 130048   ;;  %vm274_vm3 = vcmask 122880   ;;  %s668_s2 = inlined_call_operand.vmem [shape: f32[4,16], index: 2, kind: input, shape index: {}]   ;;  %s669_s0 = inlined_call_operand.vmem [shape: f32[128,4], index: 0, kind: input, shape index: {}]   ;;  %s670_s1 = inlined_call_operand.vmem [shape: f32[2,4], index: 1, kind: input, shape index: {}]   ;;  %s671_s3 = inlined_call_operand.vmem [shape: f32[128,16], index: 3, kind: output, shape index: {0}]   ;;  %s672_s4 = inlined_call_operand.vmem [shape: f32[1,2,16], index: 4, kind: output, shape index: {1}]  }
   0x1   :  { %v84_v0 = vld [vmem:[%s668_s2] sm:$0xf]  ;;  %v17_v4 = vld [vmem:[%s669_s0 + $0x8] sm:$0xff]  ;;  %v18_v27 = vld [vmem:[%s669_s0 + $0x10] sm:$0xff] }
   0x2   :  { %v16_v1 = vld [vmem:[%s669_s0] sm:$0xff]  ;;  %338 = vmatpush.msk.msra.mxu0 %vm134_vm0, %v84_v0  ;;  %355 = vmatpush.msk.msra.mxu1 %vm134_vm0, %v84_v0  ;;  %v21_v10 = vld [vmem:[%s669_s0 + $0x28] sm:$0xff]  ;;  %v22_v30 = vld [vmem:[%s669_s0 + $0x30] sm:$0xff] }
   0x3   :  { %v394_v2 = vld [vmem:[%s670_s1] ss:$0 sm:$0xff]  ;;  %v399_v3 = vld [vmem:[%s670_s1 + $0x1] ss:$0 sm:$0xff]  ;;  %356 = vmatpush.msk.msra.mxu2 %vm134_vm0, %v84_v0  ;;  %357 = vmatpush.msk.msra.mxu3 %vm134_vm0, %v84_v0  ;;  %v25_v11 = vld [vmem:[%s669_s0 + $0x48] sm:$0xff] }
   0x4   :  { %v20_v5 = vld [vmem:[%s669_s0 + $0x20] sm:$0xff]  ;;  %v34_v7 = vmul.f32 %v394_v2, %v16_v1  ;;  %v35_v12 = vmul.f32 %v394_v2, %v17_v4  ;;  %v39_v17 = vmul.f32 %v394_v2, %v21_v10  ;;  %v43_v18 = vmul.f32 %v394_v2, %v25_v11  ;;  %v29_v23 = vld [vmem:[%s669_s0 + $0x68] sm:$0xff]  ;;  %v26_v32 = vld [vmem:[%s669_s0 + $0x50] sm:$0xff] }
   0x5   :  { %v24_v6 = vld [vmem:[%s669_s0 + $0x40] sm:$0xff]  ;;  %v38_v8 = vmul.f32 %v394_v2, %v20_v5  ;;  %v47_v31 = vmul.f32 %v394_v2, %v29_v23  ;;  %v36_v35 = vmul.f32 %v394_v2, %v18_v27  ;;  %v40_v37 = vmul.f32 %v394_v2, %v22_v30  ;;  %v30_v38 = vld [vmem:[%s669_s0 + $0x70] sm:$0xff]  ;;  %v19_v45 = vld [vmem:[%s669_s0 + $0x18] sm:$0xff] }
   0x6   :  { %v42_v9 = vmul.f32 %v394_v2, %v24_v6  ;;  %v28_v13 = vld [vmem:[%s669_s0 + $0x60] sm:$0xff]  ;;  %v52_v14 = vadd.f32 %v399_v3, %v34_v7  ;;  %v53_v25 = vadd.f32 %v399_v3, %v35_v12  ;;  %v57_v26 = vadd.f32 %v399_v3, %v39_v17  ;;  %v23_v47 = vld [vmem:[%s669_s0 + $0x38] sm:$0xff] }
   0x7   :  { %v56_v15 = vadd.f32 %v399_v3, %v38_v8  ;;  %v46_v19 = vmul.f32 %v394_v2, %v28_v13  ;;  %v61_v28 = vadd.f32 %v399_v3, %v43_v18  ;;  %v65_v33 = vadd.f32 %v399_v3, %v47_v31  ;;  %v27_v48 = vld [vmem:[%s669_s0 + $0x58] sm:$0xff] }
   0x8   :  { %v60_v16 = vadd.f32 %v399_v3, %v42_v9  ;;  %v68_v20 = vmax.f32 %v52_v14, 0.0  ;;  %v69_v34 = vmax.f32 %v53_v25, 0.0  ;;  %v73_v36 = vmax.f32 %v57_v26, 0.0  ;;  %v31_v54 = vld [vmem:[%s669_s0 + $0x78] sm:$0xff] }
   0x9   :  { %v72_v21 = vmax.f32 %v56_v15, 0.0  ;;  %v64_v24 = vadd.f32 %v399_v3, %v46_v19  ;;  %v77_v39 = vmax.f32 %v61_v28, 0.0  ;;  %v44_v40 = vmul.f32 %v394_v2, %v26_v32 }
   0xa   :  { %v76_v22 = vmax.f32 %v60_v16, 0.0  ;;  %339 = vmatmul.msk.f32.vlgmr.msra.gmra.mxu0 %vm85_vm1, %v68_v20  ;;  %v81_v41 = vmax.f32 %v65_v33, 0.0  ;;  %v48_v42 = vmul.f32 %v394_v2, %v30_v38  ;;  %v54_v43 = vadd.f32 %v399_v3, %v36_v35 }
   0xb   :  { %343 = vmatmul.msk.f32.vlgmr.msra.gmra.mxu1 %vm85_vm1, %v72_v21  ;;  %v80_v29 = vmax.f32 %v64_v24, 0.0  ;;  %v58_v44 = vadd.f32 %v399_v3, %v40_v37  ;;  %v62_v46 = vadd.f32 %v399_v3, %v44_v40  ;;  %v37_v51 = vmul.f32 %v394_v2, %v19_v45 }
   0xc   :  { %347 = vmatmul.msk.f32.vlgmr.msra.gmra.mxu2 %vm85_vm1, %v76_v22  ;;  %v66_v49 = vadd.f32 %v399_v3, %v48_v42  ;;  %v70_v50 = vmax.f32 %v54_v43, 0.0  ;;  %v41_v53 = vmul.f32 %v394_v2, %v23_v47  ;;  %v45_v56 = vmul.f32 %v394_v2, %v27_v48 }
   0xd   :  { %351 = vmatmul.msk.f32.vlgmr.msra.gmra.mxu3 %vm85_vm1, %v80_v29  ;;  %v74_v52 = vmax.f32 %v58_v44, 0.0  ;;  %v78_v55 = vmax.f32 %v62_v46, 0.0  ;;  %v49_v58 = vmul.f32 %v394_v2, %v31_v54  ;;  %v55_v59 = vadd.f32 %v399_v3, %v37_v51 }
   0xe   :  { %v82_v57 = vmax.f32 %v66_v49, 0.0  ;;  %v59_v60 = vadd.f32 %v399_v3, %v41_v53  ;;  %v63_v61 = vadd.f32 %v399_v3, %v45_v56 }
   0xf   :  { %v67_v62 = vadd.f32 %v399_v3, %v49_v58  ;;  %v71_v63 = vmax.f32 %v55_v59, 0.0 }
  0x10   :  { %v75_v0 = vmax.f32 %v59_v60, 0.0  ;;  %v79_v1 = vmax.f32 %v63_v61, 0.0 }
  0x11   :  { %v83_v2 = vmax.f32 %v67_v62, 0.0 }
  0x12   :  { %340 = vmatmul.msk.f32.gmra.mxu0 %vm85_vm1, %v69_v34 }
  0x13   :  { %344 = vmatmul.msk.f32.gmra.mxu1 %vm85_vm1, %v73_v36 }
  0x14   :  { %348 = vmatmul.msk.f32.gmra.mxu2 %vm85_vm1, %v77_v39 }
  0x15   :  { %352 = vmatmul.msk.f32.gmra.mxu3 %vm85_vm1, %v81_v41 }
  0x1a   :  { %341 = vmatmul.msk.f32.gmra.mxu0 %vm85_vm1, %v70_v50 }
  0x1b   :  { %345 = vmatmul.msk.f32.gmra.mxu1 %vm85_vm1, %v74_v52 }
  0x1c   :  { %349 = vmatmul.msk.f32.gmra.mxu2 %vm85_vm1, %v78_v55 }
  0x1d   :  { %353 = vmatmul.msk.f32.gmra.mxu3 %vm85_vm1, %v82_v57 }
  0x22   :  { %342 = vmatmul.msk.f32.gmra.mxu0 %vm85_vm1, %v71_v63 }
  0x23   :  { %346 = vmatmul.msk.f32.gmra.mxu1 %vm85_vm1, %v75_v0 }
  0x24   :  { %350 = vmatmul.msk.f32.gmra.mxu2 %vm85_vm1, %v79_v1 }
  0x25   :  { %354 = vmatmul.msk.f32.gmra.mxu3 %vm85_vm1, %v83_v2 }
  0x87   :  { %v494_v4 = vpop.f32.mrf.mxu0 }
  0x88   :  { %v496_v5 = vpop.f32.mrf.mxu1  ;;  %204 = vst.msk [vmem:[%s671_s3] sm:$0xff] %vm203_vm2, %v494_v4  ;;  %v220_v14 = vsel %vm203_vm2, %v494_v4, 0.0 }
  0x89   :  { %208 = vst.msk [vmem:[%s671_s3 + $0x20] sm:$0xff] %vm203_vm2, %v496_v5  ;;  %v227_v24 = vsel %vm203_vm2, %v496_v5, 0.0 }
  0x8f   :  { %v508_v3 = vpop.f32.mrf.mxu2  ;;  %v510_v6 = vpop.f32.mrf.mxu0 }
  0x90   :  { %v512_v7 = vpop.f32.mrf.mxu1  ;;  %212 = vst.msk [vmem:[%s671_s3 + $0x40] sm:$0xff] %vm203_vm2, %v508_v3  ;;  %v524_v8 = vpop.f32.mrf.mxu3  ;;  %v221_v13 = vsel %vm203_vm2, %v510_v6, 0.0  ;;  %v235_v34 = vsel %vm203_vm2, %v508_v3, 0.0 }
  0x91   :  { %205 = vst.msk [vmem:[%s671_s3 + $0x8] sm:$0xff] %vm203_vm2, %v510_v6  ;;  %v222_v16 = vadd.f32 %v221_v13, %v220_v14  ;;  %v229_v26 = vsel %vm203_vm2, %v512_v7, 0.0  ;;  %v243_v42 = vsel %vm203_vm2, %v524_v8, 0.0 }
  0x92   :  { %209 = vst.msk [vmem:[%s671_s3 + $0x28] sm:$0xff] %vm203_vm2, %v512_v7 }
  0x93   :  { %216 = vst.msk [vmem:[%s671_s3 + $0x60] sm:$0xff] %vm203_vm2, %v524_v8 }
  0x97   :  { %v536_v9 = vpop.f32.mrf.mxu2  ;;  %v161_v10 = vpop.f32.mrf.mxu0 }
  0x98   :  { %v538_v11 = vpop.f32.mrf.mxu1  ;;  %213 = vst.msk [vmem:[%s671_s3 + $0x48] sm:$0xff] %vm203_vm2, %v536_v9  ;;  %v549_v12 = vpop.f32.mrf.mxu3  ;;  %v223_v15 = vsel %vm203_vm2, %v161_v10, 0.0  ;;  %v237_v36 = vsel %vm203_vm2, %v536_v9, 0.0 }
  0x99   :  { %206 = vst.msk [vmem:[%s671_s3 + $0x10] sm:$0xff] %vm203_vm2, %v161_v10  ;;  %v224_v18 = vadd.f32 %v223_v15, %v222_v16  ;;  %v231_v28 = vsel %vm203_vm2, %v538_v11, 0.0  ;;  %v245_v44 = vsel %vm203_vm2, %v549_v12, 0.0 }
  0x9a   :  { %210 = vst.msk [vmem:[%s671_s3 + $0x30] sm:$0xff] %vm203_vm2, %v538_v11 }
  0x9b   :  { %217 = vst.msk [vmem:[%s671_s3 + $0x68] sm:$0xff] %vm203_vm2, %v549_v12 }
  0x9f   :  { %v566_v17 = vpop.f32.mrf.mxu2  ;;  %v164_v19 = vpop.f32.mrf.mxu0 }
  0xa0   :  { %v568_v20 = vpop.f32.mrf.mxu1  ;;  %214 = vst.msk [vmem:[%s671_s3 + $0x50] sm:$0xff] %vm203_vm2, %v566_v17  ;;  %v225_v21 = vsel %vm203_vm2, %v164_v19, 0.0  ;;  %v580_v22 = vpop.f32.mrf.mxu3  ;;  %v239_v38 = vsel %vm203_vm2, %v566_v17, 0.0 }
  0xa1   :  { %207 = vst.msk [vmem:[%s671_s3 + $0x18] sm:$0xff] %vm203_vm2, %v164_v19  ;;  %v226_v23 = vadd.f32 %v225_v21, %v224_v18  ;;  %v233_v29 = vsel %vm203_vm2, %v568_v20, 0.0  ;;  %v247_v46 = vsel %vm203_vm2, %v580_v22, 0.0 }
  0xa2   :  { %211 = vst.msk [vmem:[%s671_s3 + $0x38] sm:$0xff] %vm203_vm2, %v568_v20 }
  0xa3   :  { %218 = vst.msk [vmem:[%s671_s3 + $0x70] sm:$0xff] %vm203_vm2, %v580_v22  ;;  %v228_v25 = vadd.f32 %v227_v24, %v226_v23 }
  0xa5   :  { %v230_v27 = vadd.f32 %v229_v26, %v228_v25 }
  0xa7   :  { %v600_v30 = vpop.f32.mrf.mxu2  ;;  %v232_v31 = vadd.f32 %v231_v28, %v230_v27 }
  0xa8   :  { %215 = vst.msk [vmem:[%s671_s3 + $0x58] sm:$0xff] %vm203_vm2, %v600_v30  ;;  %v607_v32 = vpop.f32.mrf.mxu3  ;;  %v241_v39 = vsel %vm203_vm2, %v600_v30, 0.0 }
  0xa9   :  { %v234_v33 = vadd.f32 %v233_v29, %v232_v31  ;;  %219 = vst.msk [vmem:[%s671_s3 + $0x78] sm:$0xff] %vm203_vm2, %v607_v32  ;;  %v249_v47 = vsel %vm203_vm2, %v607_v32, 0.0 }
  0xab   :  { %v236_v35 = vadd.f32 %v235_v34, %v234_v33 }
  0xad   :  { %v238_v37 = vadd.f32 %v237_v36, %v236_v35 }
  0xaf   :  { %v240_v40 = vadd.f32 %v239_v38, %v238_v37 }
  0xb1   :  { %v242_v41 = vadd.f32 %v241_v39, %v240_v40 }
  0xb3   :  { %v244_v43 = vadd.f32 %v243_v42, %v242_v41 }
  0xb5   :  { %v246_v45 = vadd.f32 %v245_v44, %v244_v43 }
  0xb7   :  { %v248_v48 = vadd.f32 %v247_v46, %v246_v45 }
  0xb9   :  { %v250_v49 = vadd.f32 %v249_v47, %v248_v48 }
  0xbb   :  { %v251_v50 = vrot.slane %v250_v49, 4 }
  0xbd   :  { %v252_v51 = vadd.f32 %v251_v50, %v250_v49 }
  0xbf   :  { %v253_v52 = vrot.slane %v252_v51, 2 }
  0xc1   :  { %v254_v53 = vadd.f32 %v253_v52, %v252_v51 }
  0xc3   :  { %v255_v54 = vrot.slane %v254_v53, 1 }
  0xc5   :  { %v256_v55 = vadd.f32 %v255_v54, %v254_v53 }
  0xc7   :  { %v257_v56 = vmul.f32 0.0078125, %v256_v55  ;;  %275 = vst.msk [vmem:[%s672_s4] sm:$0x1] %vm274_vm3, %v256_v55 }
  0xc9   :  { %v258_v57 = vsub.f32 %v494_v4, %v257_v56  ;;  %v259_v58 = vsub.f32 %v510_v6, %v257_v56  ;;  %v260_v59 = vsub.f32 %v161_v10, %v257_v56  ;;  %v261_v60 = vsub.f32 %v164_v19, %v257_v56 }
  0xca   :  { %v262_v63 = vsub.f32 %v496_v5, %v257_v56  ;;  %v263_v1 = vsub.f32 %v512_v7, %v257_v56  ;;  %v264_v16 = vsub.f32 %v538_v11, %v257_v56  ;;  %v265_v18 = vsub.f32 %v568_v20, %v257_v56 }
  0xcb   :  { %v276_v61 = vmul.f32 %v258_v57, %v258_v57  ;;  %v277_v62 = vmul.f32 %v259_v58, %v259_v58  ;;  %v278_v0 = vmul.f32 %v260_v59, %v260_v59  ;;  %v279_v2 = vmul.f32 %v261_v60, %v261_v60 }
  0xcc   :  { %v280_v4 = vmul.f32 %v262_v63, %v262_v63  ;;  %v281_v19 = vmul.f32 %v263_v1, %v263_v1  ;;  %v266_v7 = vsub.f32 %v508_v3, %v257_v56  ;;  %v282_v23 = vmul.f32 %v264_v16, %v264_v16 }
  0xcd   :  { %v292_v13 = vsel %vm203_vm2, %v276_v61, 0.0  ;;  %v293_v14 = vsel %vm203_vm2, %v277_v62, 0.0  ;;  %v295_v6 = vsel %vm203_vm2, %v278_v0, 0.0  ;;  %v297_v5 = vsel %vm203_vm2, %v279_v2, 0.0 }
  0xce   :  { %v294_v15 = vadd.f32 %v293_v14, %v292_v13  ;;  %v299_v24 = vsel %vm203_vm2, %v280_v4, 0.0  ;;  %v267_v26 = vsub.f32 %v536_v9, %v257_v56  ;;  %v283_v27 = vmul.f32 %v265_v18, %v265_v18 }
  0xcf   :  { %v301_v11 = vsel %vm203_vm2, %v281_v19, 0.0  ;;  %v268_v29 = vsub.f32 %v566_v17, %v257_v56  ;;  %v284_v31 = vmul.f32 %v266_v7, %v266_v7  ;;  %v303_v20 = vsel %vm203_vm2, %v282_v23, 0.0 }
  0xd0   :  { %v296_v10 = vadd.f32 %v295_v6, %v294_v15  ;;  %v269_v34 = vsub.f32 %v600_v30, %v257_v56  ;;  %v285_v35 = vmul.f32 %v267_v26, %v267_v26  ;;  %v305_v3 = vsel %vm203_vm2, %v283_v27, 0.0 }
  0xd1   :  { %v270_v37 = vsub.f32 %v524_v8, %v257_v56  ;;  %v286_v38 = vmul.f32 %v268_v29, %v268_v29  ;;  %v307_v9 = vsel %vm203_vm2, %v284_v31, 0.0  ;;  %v271_v40 = vsub.f32 %v549_v12, %v257_v56 }
  0xd2   :  { %v298_v21 = vadd.f32 %v297_v5, %v296_v10  ;;  %v287_v41 = vmul.f32 %v269_v34, %v269_v34  ;;  %v309_v17 = vsel %vm203_vm2, %v285_v35, 0.0  ;;  %v272_v43 = vsub.f32 %v580_v22, %v257_v56 }
  0xd3   :  { %v288_v44 = vmul.f32 %v270_v37, %v270_v37  ;;  %v311_v30 = vsel %vm203_vm2, %v286_v38, 0.0  ;;  %v273_v46 = vsub.f32 %v607_v32, %v257_v56  ;;  %v289_v47 = vmul.f32 %v271_v40, %v271_v40 }
  0xd4   :  { %v300_v25 = vadd.f32 %v299_v24, %v298_v21  ;;  %v313_v8 = vsel %vm203_vm2, %v287_v41, 0.0  ;;  %v290_v49 = vmul.f32 %v272_v43, %v272_v43 }
  0xd5   :  { %v315_v50 = vsel %vm203_vm2, %v288_v44, 0.0  ;;  %v291_v51 = vmul.f32 %v273_v46, %v273_v46  ;;  %v317_v52 = vsel %vm203_vm2, %v289_v47, 0.0 }
  0xd6   :  { %v302_v28 = vadd.f32 %v301_v11, %v300_v25  ;;  %v319_v22 = vsel %vm203_vm2, %v290_v49, 0.0 }
  0xd7   :  { %v321_v55 = vsel %vm203_vm2, %v291_v51, 0.0 }
  0xd8   :  { %v304_v33 = vadd.f32 %v303_v20, %v302_v28 }
  0xda   :  { %v306_v36 = vadd.f32 %v305_v3, %v304_v33 }
  0xdc   :  { %v308_v39 = vadd.f32 %v307_v9, %v306_v36 }
  0xde   :  { %v310_v42 = vadd.f32 %v309_v17, %v308_v39 }
  0xe0   :  { %v312_v45 = vadd.f32 %v311_v30, %v310_v42 }
  0xe2   :  { %v314_v48 = vadd.f32 %v313_v8, %v312_v45 }
  0xe4   :  { %v316_v12 = vadd.f32 %v315_v50, %v314_v48 }
  0xe6   :  { %v318_v53 = vadd.f32 %v317_v52, %v316_v12 }
  0xe8   :  { %v320_v54 = vadd.f32 %v319_v22, %v318_v53 }
  0xea   :  { %v322_v57 = vadd.f32 %v321_v55, %v320_v54 }
  0xec   :  { %v323_v58 = vrot.slane %v322_v57, 4 }
  0xee   :  { %v324_v32 = vadd.f32 %v323_v58, %v322_v57 }
  0xf0   :  { %v325_v56 = vrot.slane %v324_v32, 2 }
  0xf2   :  { %v326_v59 = vadd.f32 %v325_v56, %v324_v32 }
  0xf4   :  { %v327_v60 = vrot.slane %v326_v59, 1 }
  0xf6   :  { %v328_v61 = vadd.f32 %v327_v60, %v326_v59 }
  0xf8   :  { %329 = vst.msk [vmem:[%s672_s4 + $0x1] sm:$0x1] %vm274_vm3, %v328_v61 }

// kernel: ring_embedding_forward.8
= control target key start
LH: loop header
LB: loop body
LE: loop exit
PB: predicated region body
PF: predicated region fallthrough
CT: control target
= control target key end

     0   :  { %vm93_vm0 = vcmask 130048   ;;  %vm277_vm1 = vcmask 122880   ;;  %s675_s2 = inlined_call_operand.vmem [shape: f32[16,16], index: 2, kind: input, shape index: {}]   ;;  %s676_s0 = inlined_call_operand.vmem [shape: f32[128,16], index: 0, kind: input, shape index: {}]   ;;  %s677_s1 = inlined_call_operand.vmem [shape: f32[2,16], index: 1, kind: input, shape index: {}]   ;;  %s678_s3 = inlined_call_operand.vmem [shape: f32[1,16], index: 3, kind: input, shape index: {}]   ;;  %s679_s4 = inlined_call_operand.vmem [shape: f32[128,16], index: 4, kind: output, shape index: {0}]   ;;  %s680_s5 = inlined_call_operand.vmem [shape: f32[1,2,16], index: 5, kind: output, shape index: {1}]  }
   0x1   :  { %v88_v0 = vld [vmem:[%s675_s2 + $0x8] sm:$0xff]  ;;  %v87_v1 = vld [vmem:[%s675_s2] sm:$0xff]  ;;  %v21_v28 = vld [vmem:[%s676_s0 + $0x10] sm:$0xff] }
   0x2   :  { %v19_v2 = vld [vmem:[%s676_s0] sm:$0xff]  ;;  %156 = vmatpush.msra.mxu0 %v88_v0  ;;  %357 = vmatpush.msra.mxu1 %v88_v0  ;;  %v20_v5 = vld [vmem:[%s676_s0 + $0x8] sm:$0xff]  ;;  %v25_v31 = vld [vmem:[%s676_s0 + $0x30] sm:$0xff] }
   0x3   :  { %v408_v3 = vld [vmem:[%s677_s1] ss:$0 sm:$0xff]  ;;  %v413_v4 = vld [vmem:[%s677_s1 + $0x1] ss:$0 sm:$0xff]  ;;  %358 = vmatpush.msra.mxu2 %v88_v0  ;;  %359 = vmatpush.msra.mxu3 %v88_v0  ;;  %v24_v10 = vld [vmem:[%s676_s0 + $0x28] sm:$0xff] }
   0x4   :  { %v23_v6 = vld [vmem:[%s676_s0 + $0x20] sm:$0xff]  ;;  %157 = vmatpush.msra.mxu0 %v87_v1  ;;  %v37_v7 = vmul.f32 %v408_v3, %v19_v2  ;;  %360 = vmatpush.msra.mxu1 %v87_v1  ;;  %v28_v12 = vld [vmem:[%s676_s0 + $0x48] sm:$0xff]  ;;  %v38_v15 = vmul.f32 %v408_v3, %v20_v5  ;;  %v42_v17 = vmul.f32 %v408_v3, %v24_v10  ;;  %v29_v33 = vld [vmem:[%s676_s0 + $0x50] sm:$0xff] }
   0x5   :  { %v41_v8 = vmul.f32 %v408_v3, %v23_v6  ;;  %v27_v9 = vld [vmem:[%s676_s0 + $0x40] sm:$0xff]  ;;  %361 = vmatpush.msra.mxu2 %v87_v1  ;;  %362 = vmatpush.msra.mxu3 %v87_v1  ;;  %v46_v19 = vmul.f32 %v408_v3, %v28_v12  ;;  %v32_v23 = vld [vmem:[%s676_s0 + $0x68] sm:$0xff]  ;;  %v39_v36 = vmul.f32 %v408_v3, %v21_v28  ;;  %v33_v39 = vld [vmem:[%s676_s0 + $0x70] sm:$0xff] }
   0x6   :  { %v45_v11 = vmul.f32 %v408_v3, %v27_v9  ;;  %v31_v13 = vld [vmem:[%s676_s0 + $0x60] sm:$0xff]  ;;  %v55_v14 = vadd.f32 %v413_v4, %v37_v7  ;;  %v56_v26 = vadd.f32 %v413_v4, %v38_v15  ;;  %v60_v27 = vadd.f32 %v413_v4, %v42_v17  ;;  %v22_v46 = vld [vmem:[%s676_s0 + $0x18] sm:$0xff] }
   0x7   :  { %v59_v16 = vadd.f32 %v413_v4, %v41_v8  ;;  %v49_v20 = vmul.f32 %v408_v3, %v31_v13  ;;  %v64_v29 = vadd.f32 %v413_v4, %v46_v19  ;;  %v50_v32 = vmul.f32 %v408_v3, %v32_v23  ;;  %v26_v48 = vld [vmem:[%s676_s0 + $0x38] sm:$0xff]  ;;  %v365_v5 = vld [vmem:[%s678_s3] ss:$0 sm:$0xff] }
   0x8   :  { %v63_v18 = vadd.f32 %v413_v4, %v45_v11  ;;  %v71_v21 = vmax.f32 %v55_v14, 0.0  ;;  %v72_v35 = vmax.f32 %v56_v26, 0.0  ;;  %v76_v37 = vmax.f32 %v60_v27, 0.0  ;;  %v30_v49 = vld [vmem:[%s676_s0 + $0x58] sm:$0xff] }
   0x9   :  { %v75_v22 = vmax.f32 %v59_v16, 0.0  ;;  %v67_v25 = vadd.f32 %v413_v4, %v49_v20  ;;  %v68_v34 = vadd.f32 %v413_v4, %v50_v32  ;;  %v43_v38 = vmul.f32 %v408_v3, %v25_v31  ;;  %v34_v55 = vld [vmem:[%s676_s0 + $0x78] sm:$0xff] }
   0xa   :  { %v79_v24 = vmax.f32 %v63_v18, 0.0  ;;  %341 = vmatmul.msk.f32.vlgmr.msra.gmra.mxu0 %vm93_vm0, %v71_v21  ;;  %v80_v40 = vmax.f32 %v64_v29, 0.0  ;;  %v47_v41 = vmul.f32 %v408_v3, %v29_v33  ;;  %v51_v43 = vmul.f32 %v408_v3, %v33_v39 }
   0xb   :  { %345 = vmatmul.msk.f32.vlgmr.msra.gmra.mxu1 %vm93_vm0, %v75_v22  ;;  %v83_v30 = vmax.f32 %v67_v25, 0.0  ;;  %v84_v42 = vmax.f32 %v68_v34, 0.0  ;;  %v57_v44 = vadd.f32 %v413_v4, %v39_v36  ;;  %v61_v45 = vadd.f32 %v413_v4, %v43_v38 }
   0xc   :  { %349 = vmatmul.msk.f32.vlgmr.msra.gmra.mxu2 %vm93_vm0, %v79_v24  ;;  %v65_v47 = vadd.f32 %v413_v4, %v47_v41  ;;  %v69_v50 = vadd.f32 %v413_v4, %v51_v43  ;;  %v40_v52 = vmul.f32 %v408_v3, %v22_v46  ;;  %v44_v54 = vmul.f32 %v408_v3, %v26_v48 }
   0xd   :  { %353 = vmatmul.msk.f32.vlgmr.msra.gmra.mxu3 %vm93_vm0, %v83_v30  ;;  %v73_v51 = vmax.f32 %v57_v44, 0.0  ;;  %v77_v53 = vmax.f32 %v61_v45, 0.0  ;;  %v48_v57 = vmul.f32 %v408_v3, %v30_v49  ;;  %v52_v59 = vmul.f32 %v408_v3, %v34_v55 }
   0xe   :  { %v81_v56 = vmax.f32 %v65_v47, 0.0  ;;  %v85_v58 = vmax.f32 %v69_v50, 0.0  ;;  %v58_v60 = vadd.f32 %v413_v4, %v40_v52  ;;  %v62_v61 = vadd.f32 %v413_v4, %v44_v54 }
   0xf   :  { %v66_v62 = vadd.f32 %v413_v4, %v48_v57  ;;  %v70_v63 = vadd.f32 %v413_v4, %v52_v59 }
  0x10   :  { %v74_v0 = vmax.f32 %v58_v60, 0.0  ;;  %v78_v1 = vmax.f32 %v62_v61, 0.0 }
  0x11   :  { %v82_v2 = vmax.f32 %v66_v62, 0.0  ;;  %v86_v3 = vmax.f32 %v70_v63, 0.0 }
  0x12   :  { %342 = vmatmul.msk.f32.gmra.mxu0 %vm93_vm0, %v72_v35 }
  0x13   :  { %346 = vmatmul.msk.f32.gmra.mxu1 %vm93_vm0, %v76_v37 }
  0x14   :  { %350 = vmatmul.msk.f32.gmra.mxu2 %vm93_vm0, %v80_v40 }
  0x15   :  { %354 = vmatmul.msk.f32.gmra.mxu3 %vm93_vm0, %v84_v42 }
  0x1a   :  { %343 = vmatmul.msk.f32.gmra.mxu0 %vm93_vm0, %v73_v51 }
  0x1b   :  { %347 = vmatmul.msk.f32.gmra.mxu1 %vm93_vm0, %v77_v53 }
  0x1c   :  { %351 = vmatmul.msk.f32.gmra.mxu2 %vm93_vm0, %v81_v56 }
  0x1d   :  { %355 = vmatmul.msk.f32.gmra.mxu3 %vm93_vm0, %v85_v58 }
  0x22   :  { %344 = vmatmul.msk.f32.gmra.mxu0 %vm93_vm0, %v74_v0 }
  0x23   :  { %348 = vmatmul.msk.f32.gmra.mxu1 %vm93_vm0, %v78_v1 }
  0x24   :  { %352 = vmatmul.msk.f32.gmra.mxu2 %vm93_vm0, %v82_v2 }
  0x25   :  { %356 = vmatmul.msk.f32.gmra.mxu3 %vm93_vm0, %v86_v3 }
  0x87   :  { %v159_v6 = vpop.f32.mrf.mxu0 }
  0x88   :  { %v171_v7 = vpop.f32.mrf.mxu1  ;;  %v511_v8 = vadd.f32 %v365_v5, %v159_v6 }
  0x89   :  { %v513_v4 = vadd.f32 %v365_v5, %v171_v7 }
  0x8a   :  { %207 = vst.msk [vmem:[%s679_s4] sm:$0xff] %vm93_vm0, %v511_v8  ;;  %v223_v26 = vsel %vm93_vm0, %v511_v8, 0.0 }
  0x8b   :  { %211 = vst.msk [vmem:[%s679_s4 + $0x20] sm:$0xff] %vm93_vm0, %v513_v4  ;;  %v230_v40 = vsel %vm93_vm0, %v513_v4, 0.0 }
  0x8f   :  { %v183_v9 = vpop.f32.mrf.mxu2  ;;  %v162_v10 = vpop.f32.mrf.mxu0 }
  0x90   :  { %v174_v11 = vpop.f32.mrf.mxu1  ;;  %v525_v12 = vadd.f32 %v365_v5, %v183_v9  ;;  %v527_v13 = vadd.f32 %v365_v5, %v162_v10  ;;  %v195_v15 = vpop.f32.mrf.mxu3 }
  0x91   :  { %v529_v14 = vadd.f32 %v365_v5, %v174_v11  ;;  %v536_v16 = vadd.f32 %v365_v5, %v195_v15 }
  0x92   :  { %215 = vst.msk [vmem:[%s679_s4 + $0x40] sm:$0xff] %vm93_vm0, %v525_v12  ;;  %v224_v25 = vsel %vm93_vm0, %v527_v13, 0.0  ;;  %v238_v52 = vsel %vm93_vm0, %v525_v12, 0.0 }
  0x93   :  { %208 = vst.msk [vmem:[%s679_s4 + $0x8] sm:$0xff] %vm93_vm0, %v527_v13  ;;  %v225_v29 = vadd.f32 %v224_v25, %v223_v26  ;;  %v232_v42 = vsel %vm93_vm0, %v529_v14, 0.0  ;;  %v246_v60 = vsel %vm93_vm0, %v536_v16, 0.0 }
  0x94   :  { %212 = vst.msk [vmem:[%s679_s4 + $0x28] sm:$0xff] %vm93_vm0, %v529_v14 }
  0x95   :  { %219 = vst.msk [vmem:[%s679_s4 + $0x60] sm:$0xff] %vm93_vm0, %v536_v16 }
  0x97   :  { %v186_v17 = vpop.f32.mrf.mxu2  ;;  %v165_v18 = vpop.f32.mrf.mxu0 }
  0x98   :  { %v177_v19 = vpop.f32.mrf.mxu1  ;;  %v553_v20 = vadd.f32 %v365_v5, %v186_v17  ;;  %v555_v21 = vadd.f32 %v365_v5, %v165_v18  ;;  %v198_v23 = vpop.f32.mrf.mxu3 }
  0x99   :  { %v557_v22 = vadd.f32 %v365_v5, %v177_v19  ;;  %v564_v24 = vadd.f32 %v365_v5, %v198_v23 }
  0x9a   :  { %216 = vst.msk [vmem:[%s679_s4 + $0x48] sm:$0xff] %vm93_vm0, %v553_v20  ;;  %v226_v27 = vsel %vm93_vm0, %v555_v21, 0.0  ;;  %v240_v54 = vsel %vm93_vm0, %v553_v20, 0.0 }
  0x9b   :  { %209 = vst.msk [vmem:[%s679_s4 + $0x10] sm:$0xff] %vm93_vm0, %v555_v21  ;;  %v227_v36 = vadd.f32 %v226_v27, %v225_v29  ;;  %v234_v46 = vsel %vm93_vm0, %v557_v22, 0.0  ;;  %v248_v62 = vsel %vm93_vm0, %v564_v24, 0.0 }
  0x9c   :  { %213 = vst.msk [vmem:[%s679_s4 + $0x30] sm:$0xff] %vm93_vm0, %v557_v22 }
  0x9d   :  { %220 = vst.msk [vmem:[%s679_s4 + $0x68] sm:$0xff] %vm93_vm0, %v564_v24 }
  0x9f   :  { %v189_v28 = vpop.f32.mrf.mxu2  ;;  %v168_v30 = vpop.f32.mrf.mxu0 }
  0xa0   :  { %v180_v31 = vpop.f32.mrf.mxu1  ;;  %v190_v32 = vadd.f32 %v365_v5, %v189_v28  ;;  %v169_v33 = vadd.f32 %v365_v5, %v168_v30  ;;  %v201_v35 = vpop.f32.mrf.mxu3 }
  0xa1   :  { %v587_v34 = vadd.f32 %v365_v5, %v180_v31  ;;  %v202_v37 = vadd.f32 %v365_v5, %v201_v35 }
  0xa2   :  { %217 = vst.msk [vmem:[%s679_s4 + $0x50] sm:$0xff] %vm93_vm0, %v190_v32  ;;  %v228_v38 = vsel %vm93_vm0, %v169_v33, 0.0  ;;  %v242_v56 = vsel %vm93_vm0, %v190_v32, 0.0 }
  0xa3   :  { %210 = vst.msk [vmem:[%s679_s4 + $0x18] sm:$0xff] %vm93_vm0, %v169_v33  ;;  %v229_v39 = vadd.f32 %v228_v38, %v227_v36  ;;  %v236_v47 = vsel %vm93_vm0, %v587_v34, 0.0  ;;  %v250_v0 = vsel %vm93_vm0, %v202_v37, 0.0 }
  0xa4   :  { %214 = vst.msk [vmem:[%s679_s4 + $0x38] sm:$0xff] %vm93_vm0, %v587_v34 }
  0xa5   :  { %221 = vst.msk [vmem:[%s679_s4 + $0x70] sm:$0xff] %vm93_vm0, %v202_v37  ;;  %v231_v41 = vadd.f32 %v230_v40, %v229_v39 }
  0xa7   :  { %v192_v43 = vpop.f32.mrf.mxu2  ;;  %v233_v44 = vadd.f32 %v232_v42, %v231_v41 }
  0xa8   :  { %v611_v45 = vadd.f32 %v365_v5, %v192_v43  ;;  %v204_v48 = vpop.f32.mrf.mxu3 }
  0xa9   :  { %v235_v49 = vadd.f32 %v234_v46, %v233_v44  ;;  %v205_v50 = vadd.f32 %v365_v5, %v204_v48 }
  0xaa   :  { %218 = vst.msk [vmem:[%s679_s4 + $0x58] sm:$0xff] %vm93_vm0, %v611_v45  ;;  %v244_v57 = vsel %vm93_vm0, %v611_v45, 0.0 }
  0xab   :  { %v237_v51 = vadd.f32 %v236_v47, %v235_v49  ;;  %222 = vst.msk [vmem:[%s679_s4 + $0x78] sm:$0xff] %vm93_vm0, %v205_v50  ;;  %v252_v1 = vsel %vm93_vm0, %v205_v50, 0.0 }
  0xad   :  { %v239_v53 = vadd.f32 %v238_v52, %v237_v51 }
  0xaf   :  { %v241_v55 = vadd.f32 %v240_v54, %v239_v53 }
  0xb1   :  { %v243_v58 = vadd.f32 %v242_v56, %v241_v55 }
  0xb3   :  { %v245_v59 = vadd.f32 %v244_v57, %v243_v58 }
  0xb5   :  { %v247_v61 = vadd.f32 %v246_v60, %v245_v59 }
  0xb7   :  { %v249_v63 = vadd.f32 %v248_v62, %v247_v61 }
  0xb9   :  { %v251_v2 = vadd.f32 %v250_v0, %v249_v63 }
  0xbb   :  { %v253_v3 = vadd.f32 %v252_v1, %v251_v2 }
  0xbd   :  { %v254_v5 = vrot.slane %v253_v3, 4 }
  0xbf   :  { %v255_v6 = vadd.f32 %v254_v5, %v253_v3 }
  0xc1   :  { %v256_v7 = vrot.slane %v255_v6, 2 }
  0xc3   :  { %v257_v9 = vadd.f32 %v256_v7, %v255_v6 }
  0xc5   :  { %v258_v10 = vrot.slane %v257_v9, 1 }
  0xc7   :  { %v259_v11 = vadd.f32 %v258_v10, %v257_v9 }
  0xc9   :  { %v260_v15 = vmul.f32 0.0078125, %v259_v11  ;;  %278 = vst.msk [vmem:[%s680_s5] sm:$0x1] %vm277_vm1, %v259_v11 }
  0xcb   :  { %v261_v17 = vsub.f32 %v511_v8, %v260_v15  ;;  %v262_v18 = vsub.f32 %v527_v13, %v260_v15  ;;  %v266_v19 = vsub.f32 %v529_v14, %v260_v15  ;;  %v263_v23 = vsub.f32 %v555_v21, %v260_v15 }
  0xcc   :  { %v269_v25 = vsub.f32 %v525_v12, %v260_v15  ;;  %v270_v26 = vsub.f32 %v553_v20, %v260_v15  ;;  %v271_v27 = vsub.f32 %v190_v32, %v260_v15  ;;  %v273_v28 = vsub.f32 %v536_v16, %v260_v15 }
  0xcd   :  { %v274_v29 = vsub.f32 %v564_v24, %v260_v15  ;;  %v275_v30 = vsub.f32 %v202_v37, %v260_v15  ;;  %v276_v31 = vsub.f32 %v205_v50, %v260_v15  ;;  %v264_v35 = vsub.f32 %v169_v33, %v260_v15 }
  0xce   :  { %v279_v36 = vmul.f32 %v261_v17, %v261_v17  ;;  %v280_v8 = vmul.f32 %v262_v18, %v262_v18  ;;  %v265_v13 = vsub.f32 %v513_v4, %v260_v15  ;;  %v281_v38 = vmul.f32 %v263_v23, %v263_v23 }
  0xcf   :  { %v282_v14 = vmul.f32 %v264_v35, %v264_v35  ;;  %v267_v20 = vsub.f32 %v557_v22, %v260_v15  ;;  %v268_v37 = vsub.f32 %v587_v34, %v260_v15  ;;  %v284_v33 = vmul.f32 %v266_v19, %v266_v19 }
  0xd0   :  { %v295_v21 = vsel %vm93_vm0, %v279_v36, 0.0  ;;  %v296_v12 = vsel %vm93_vm0, %v280_v8, 0.0  ;;  %v283_v32 = vmul.f32 %v265_v13, %v265_v13  ;;  %v298_v16 = vsel %vm93_vm0, %v281_v38, 0.0 }
  0xd1   :  { %v297_v39 = vadd.f32 %v296_v12, %v295_v21  ;;  %v300_v40 = vsel %vm93_vm0, %v282_v14, 0.0  ;;  %v285_v4 = vmul.f32 %v267_v20, %v267_v20  ;;  %v286_v44 = vmul.f32 %v268_v37, %v268_v37 }
  0xd2   :  { %v302_v42 = vsel %vm93_vm0, %v283_v32, 0.0  ;;  %v304_v46 = vsel %vm93_vm0, %v284_v33, 0.0  ;;  %v287_v48 = vmul.f32 %v269_v25, %v269_v25  ;;  %v272_v50 = vsub.f32 %v611_v45, %v260_v15 }
  0xd3   :  { %v299_v24 = vadd.f32 %v298_v16, %v297_v39  ;;  %v306_v22 = vsel %vm93_vm0, %v285_v4, 0.0  ;;  %v288_v51 = vmul.f32 %v270_v26, %v270_v26  ;;  %v308_v34 = vsel %vm93_vm0, %v286_v44, 0.0 }
  0xd4   :  { %v289_v53 = vmul.f32 %v271_v27, %v271_v27  ;;  %v310_v54 = vsel %vm93_vm0, %v287_v48, 0.0  ;;  %v290_v56 = vmul.f32 %v272_v50, %v272_v50  ;;  %v291_v59 = vmul.f32 %v273_v28, %v273_v28 }
  0xd5   :  { %v301_v41 = vadd.f32 %v300_v40, %v299_v24  ;;  %v312_v57 = vsel %vm93_vm0, %v288_v51, 0.0  ;;  %v292_v62 = vmul.f32 %v274_v29, %v274_v29  ;;  %v293_v0 = vmul.f32 %v275_v30, %v275_v30 }
  0xd6   :  { %v314_v60 = vsel %vm93_vm0, %v289_v53, 0.0  ;;  %v316_v63 = vsel %vm93_vm0, %v290_v56, 0.0  ;;  %v318_v1 = vsel %vm93_vm0, %v291_v59, 0.0  ;;  %v294_v3 = vmul.f32 %v276_v31, %v276_v31 }
  0xd7   :  { %v303_v43 = vadd.f32 %v302_v42, %v301_v41  ;;  %v320_v5 = vsel %vm93_vm0, %v292_v62, 0.0  ;;  %v322_v7 = vsel %vm93_vm0, %v293_v0, 0.0 }
  0xd8   :  { %v324_v10 = vsel %vm93_vm0, %v294_v3, 0.0 }
  0xd9   :  { %v305_v47 = vadd.f32 %v304_v46, %v303_v43 }
  0xdb   :  { %v307_v49 = vadd.f32 %v306_v22, %v305_v47 }
  0xdd   :  { %v309_v52 = vadd.f32 %v308_v34, %v307_v49 }
  0xdf   :  { %v311_v55 = vadd.f32 %v310_v54, %v309_v52 }
  0xe1   :  { %v313_v58 = vadd.f32 %v312_v57, %v311_v55 }
  0xe3   :  { %v315_v61 = vadd.f32 %v314_v60, %v313_v58 }
  0xe5   :  { %v317_v45 = vadd.f32 %v316_v63, %v315_v61 }
  0xe7   :  { %v319_v2 = vadd.f32 %v318_v1, %v317_v45 }
  0xe9   :  { %v321_v6 = vadd.f32 %v320_v5, %v319_v2 }
  0xeb   :  { %v323_v9 = vadd.f32 %v322_v7, %v321_v6 }
  0xed   :  { %v325_v11 = vadd.f32 %v324_v10, %v323_v9 }
  0xef   :  { %v326_v15 = vrot.slane %v325_v11, 4 }
  0xf1   :  { %v327_v17 = vadd.f32 %v326_v15, %v325_v11 }
  0xf3   :  { %v328_v18 = vrot.slane %v327_v17, 2 }
  0xf5   :  { %v329_v19 = vadd.f32 %v328_v18, %v327_v17 }
  0xf7   :  { %v330_v23 = vrot.slane %v329_v19, 1 }
  0xf9   :  { %v331_v25 = vadd.f32 %v330_v23, %v329_v19 }
  0xfb   :  { %332 = vst.msk [vmem:[%s680_s5 + $0x1] sm:$0x1] %vm277_vm1, %v331_v25 }

// kernel: ring_embedding_forward.9
= control target key start
LH: loop header
LB: loop body
LE: loop exit
PB: predicated region body
PF: predicated region fallthrough
CT: control target
= control target key end

     0   :  { %vm86_vm0 = vcmask 130048   ;;  %s541_s2 = inlined_call_operand.vmem [shape: f32[16,128], index: 2, kind: input, shape index: {}]   ;;  %s542_s0 = inlined_call_operand.vmem [shape: f32[128,16], index: 0, kind: input, shape index: {}]   ;;  %s543_s1 = inlined_call_operand.vmem [shape: f32[2,16], index: 1, kind: input, shape index: {}]   ;;  %s544_s3 = inlined_call_operand.vmem [shape: f32[128,128], index: 3, kind: output, shape index: {0}]   ;;  %s545_s4 = inlined_call_operand.vmem [shape: f32[1,2,128], index: 4, kind: output, shape index: {1}]  }
   0x1   :  { %v85_v0 = vld [vmem:[%s541_s2 + $0x8] sm:$0xff]  ;;  %v84_v1 = vld [vmem:[%s541_s2] sm:$0xff]  ;;  %v18_v28 = vld [vmem:[%s542_s0 + $0x10] sm:$0xff] }
   0x2   :  { %v16_v2 = vld [vmem:[%s542_s0] sm:$0xff]  ;;  %149 = vmatpush.msra.mxu0 %v85_v0  ;;  %317 = vmatpush.msra.mxu1 %v85_v0  ;;  %v17_v5 = vld [vmem:[%s542_s0 + $0x8] sm:$0xff]  ;;  %v22_v31 = vld [vmem:[%s542_s0 + $0x30] sm:$0xff] }
   0x3   :  { %v362_v3 = vld [vmem:[%s543_s1] ss:$0 sm:$0xff]  ;;  %v367_v4 = vld [vmem:[%s543_s1 + $0x1] ss:$0 sm:$0xff]  ;;  %318 = vmatpush.msra.mxu2 %v85_v0  ;;  %319 = vmatpush.msra.mxu3 %v85_v0  ;;  %v21_v10 = vld [vmem:[%s542_s0 + $0x28] sm:$0xff] }
   0x4   :  { %v20_v6 = vld [vmem:[%s542_s0 + $0x20] sm:$0xff]  ;;  %150 = vmatpush.msra.mxu0 %v84_v1  ;;  %v34_v7 = vmul.f32 %v362_v3, %v16_v2  ;;  %320 = vmatpush.msra.mxu1 %v84_v1  ;;  %v25_v12 = vld [vmem:[%s542_s0 + $0x48] sm:$0xff]  ;;  %v35_v15 = vmul.f32 %v362_v3, %v17_v5  ;;  %v39_v17 = vmul.f32 %v362_v3, %v21_v10  ;;  %v26_v33 = vld [vmem:[%s542_s0 + $0x50] sm:$0xff] }
   0x5   :  { %v38_v8 = vmul.f32 %v362_v3, %v20_v6  ;;  %v24_v9 = vld [vmem:[%s542_s0 + $0x40] sm:$0xff]  ;;  %321 = vmatpush.msra.mxu2 %v84_v1  ;;  %322 = vmatpush.msra.mxu3 %v84_v1  ;;  %v43_v19 = vmul.f32 %v362_v3, %v25_v12  ;;  %v29_v23 = vld [vmem:[%s542_s0 + $0x68] sm:$0xff]  ;;  %v36_v36 = vmul.f32 %v362_v3, %v18_v28  ;;  %v30_v39 = vld [vmem:[%s542_s0 + $0x70] sm:$0xff] }
   0x6   :  { %v42_v11 = vmul.f32 %v362_v3, %v24_v9  ;;  %v28_v13 = vld [vmem:[%s542_s0 + $0x60] sm:$0xff]  ;;  %v52_v14 = vadd.f32 %v367_v4, %v34_v7  ;;  %v53_v26 = vadd.f32 %v367_v4, %v35_v15  ;;  %v57_v27 = vadd.f32 %v367_v4, %v39_v17  ;;  %v19_v46 = vld [vmem:[%s542_s0 + $0x18] sm:$0xff] }
   0x7   :  { %v56_v16 = vadd.f32 %v367_v4, %v38_v8  ;;  %v46_v20 = vmul.f32 %v362_v3, %v28_v13  ;;  %v61_v29 = vadd.f32 %v367_v4, %v43_v19  ;;  %v47_v32 = vmul.f32 %v362_v3, %v29_v23  ;;  %v23_v48 = vld [vmem:[%s542_s0 + $0x38] sm:$0xff] }
   0x8   :  { %v60_v18 = vadd.f32 %v367_v4, %v42_v11  ;;  %v68_v21 = vmax.f32 %v52_v14, 0.0  ;;  %v69_v35 = vmax.f32 %v53_v26, 0.0  ;;  %v73_v37 = vmax.f32 %v57_v27, 0.0  ;;  %v27_v49 = vld [vmem:[%s542_s0 + $0x58] sm:$0xff] }
   0x9   :  { %v72_v22 = vmax.f32 %v56_v16, 0.0  ;;  %v64_v25 = vadd.f32 %v367_v4, %v46_v20  ;;  %v65_v34 = vadd.f32 %v367_v4, %v47_v32  ;;  %v40_v38 = vmul.f32 %v362_v3, %v22_v31  ;;  %v31_v55 = vld [vmem:[%s542_s0 + $0x78] sm:$0xff] }
   0xa   :  { %v76_v24 = vmax.f32 %v60_v18, 0.0  ;;  %301 = vmatmul.msk.f32.vlgmr.msra.gmra.mxu0 %vm86_vm0, %v68_v21  ;;  %v77_v40 = vmax.f32 %v61_v29, 0.0  ;;  %v44_v41 = vmul.f32 %v362_v3, %v26_v33  ;;  %v48_v43 = vmul.f32 %v362_v3, %v30_v39 }
   0xb   :  { %305 = vmatmul.msk.f32.vlgmr.msra.gmra.mxu1 %vm86_vm0, %v72_v22  ;;  %v80_v30 = vmax.f32 %v64_v25, 0.0  ;;  %v81_v42 = vmax.f32 %v65_v34, 0.0  ;;  %v54_v44 = vadd.f32 %v367_v4, %v36_v36  ;;  %v58_v45 = vadd.f32 %v367_v4, %v40_v38 }
   0xc   :  { %309 = vmatmul.msk.f32.vlgmr.msra.gmra.mxu2 %vm86_vm0, %v76_v24  ;;  %v62_v47 = vadd.f32 %v367_v4, %v44_v41  ;;  %v66_v50 = vadd.f32 %v367_v4, %v48_v43  ;;  %v37_v52 = vmul.f32 %v362_v3, %v19_v46  ;;  %v41_v54 = vmul.f32 %v362_v3, %v23_v48 }
   0xd   :  { %313 = vmatmul.msk.f32.vlgmr.msra.gmra.mxu3 %vm86_vm0, %v80_v30  ;;  %v70_v51 = vmax.f32 %v54_v44, 0.0  ;;  %v74_v53 = vmax.f32 %v58_v45, 0.0  ;;  %v45_v57 = vmul.f32 %v362_v3, %v27_v49  ;;  %v49_v59 = vmul.f32 %v362_v3, %v31_v55 }
   0xe   :  { %v78_v56 = vmax.f32 %v62_v47, 0.0  ;;  %v82_v58 = vmax.f32 %v66_v50, 0.0  ;;  %v55_v60 = vadd.f32 %v367_v4, %v37_v52  ;;  %v59_v61 = vadd.f32 %v367_v4, %v41_v54 }
   0xf   :  { %v63_v62 = vadd.f32 %v367_v4, %v45_v57  ;;  %v67_v63 = vadd.f32 %v367_v4, %v49_v59 }
  0x10   :  { %v71_v0 = vmax.f32 %v55_v60, 0.0  ;;  %v75_v1 = vmax.f32 %v59_v61, 0.0 }
  0x11   :  { %v79_v2 = vmax.f32 %v63_v62, 0.0  ;;  %v83_v3 = vmax.f32 %v67_v63, 0.0 }
  0x12   :  { %302 = vmatmul.msk.f32.gmra.mxu0 %vm86_vm0, %v69_v35 }
  0x13   :  { %306 = vmatmul.msk.f32.gmra.mxu1 %vm86_vm0, %v73_v37 }
  0x14   :  { %310 = vmatmul.msk.f32.gmra.mxu2 %vm86_vm0, %v77_v40 }
  0x15   :  { %314 = vmatmul.msk.f32.gmra.mxu3 %vm86_vm0, %v81_v42 }
  0x1a   :  { %303 = vmatmul.msk.f32.gmra.mxu0 %vm86_vm0, %v70_v51 }
  0x1b   :  { %307 = vmatmul.msk.f32.gmra.mxu1 %vm86_vm0, %v74_v53 }
  0x1c   :  { %311 = vmatmul.msk.f32.gmra.mxu2 %vm86_vm0, %v78_v56 }
  0x1d   :  { %315 = vmatmul.msk.f32.gmra.mxu3 %vm86_vm0, %v82_v58 }
  0x22   :  { %304 = vmatmul.msk.f32.gmra.mxu0 %vm86_vm0, %v71_v0 }
  0x23   :  { %308 = vmatmul.msk.f32.gmra.mxu1 %vm86_vm0, %v75_v1 }
  0x24   :  { %312 = vmatmul.msk.f32.gmra.mxu2 %vm86_vm0, %v79_v2 }
  0x25   :  { %316 = vmatmul.msk.f32.gmra.mxu3 %vm86_vm0, %v83_v3 }
  0x87   :  { %v152_v5 = vpop.f32.mrf.mxu0 }
  0x88   :  { %v164_v6 = vpop.f32.mrf.mxu1  ;;  %200 = vst [vmem:[%s544_s3] sm:$0xff] %v152_v5 }
  0x89   :  { %204 = vst [vmem:[%s544_s3 + $0x20] sm:$0xff] %v164_v6 }
  0x8f   :  { %v468_v4 = vpop.f32.mrf.mxu2  ;;  %v155_v7 = vpop.f32.mrf.mxu0 }
  0x90   :  { %v167_v8 = vpop.f32.mrf.mxu1  ;;  %208 = vst [vmem:[%s544_s3 + $0x40] sm:$0xff] %v468_v4  ;;  %v477_v9 = vpop.f32.mrf.mxu3  ;;  %v216_v14 = vadd.f32 %v155_v7, %v152_v5 }
  0x91   :  { %201 = vst [vmem:[%s544_s3 + $0x8] sm:$0xff] %v155_v7 }
  0x92   :  { %205 = vst [vmem:[%s544_s3 + $0x28] sm:$0xff] %v167_v8 }
  0x93   :  { %212 = vst [vmem:[%s544_s3 + $0x60] sm:$0xff] %v477_v9 }
  0x97   :  { %v486_v10 = vpop.f32.mrf.mxu2  ;;  %v158_v11 = vpop.f32.mrf.mxu0 }
  0x98   :  { %v170_v12 = vpop.f32.mrf.mxu1  ;;  %209 = vst [vmem:[%s544_s3 + $0x48] sm:$0xff] %v486_v10  ;;  %v495_v13 = vpop.f32.mrf.mxu3  ;;  %v217_v15 = vadd.f32 %v216_v14, %v158_v11 }
  0x99   :  { %202 = vst [vmem:[%s544_s3 + $0x10] sm:$0xff] %v158_v11 }
  0x9a   :  { %206 = vst [vmem:[%s544_s3 + $0x30] sm:$0xff] %v170_v12 }
  0x9b   :  { %213 = vst [vmem:[%s544_s3 + $0x68] sm:$0xff] %v495_v13 }
  0x9f   :  { %v182_v16 = vpop.f32.mrf.mxu2  ;;  %v161_v17 = vpop.f32.mrf.mxu0 }
  0xa0   :  { %v173_v18 = vpop.f32.mrf.mxu1  ;;  %210 = vst [vmem:[%s544_s3 + $0x50] sm:$0xff] %v182_v16  ;;  %v218_v19 = vadd.f32 %v217_v15, %v161_v17  ;;  %v510_v20 = vpop.f32.mrf.mxu3 }
  0xa1   :  { %203 = vst [vmem:[%s544_s3 + $0x18] sm:$0xff] %v161_v17 }
  0xa2   :  { %207 = vst [vmem:[%s544_s3 + $0x38] sm:$0xff] %v173_v18  ;;  %v219_v21 = vadd.f32 %v218_v19, %v164_v6 }
  0xa3   :  { %214 = vst [vmem:[%s544_s3 + $0x70] sm:$0xff] %v510_v20 }
  0xa4   :  { %v220_v22 = vadd.f32 %v219_v21, %v167_v8 }
  0xa6   :  { %v221_v23 = vadd.f32 %v220_v22, %v170_v12 }
  0xa7   :  { %v185_v24 = vpop.f32.mrf.mxu2 }
  0xa8   :  { %211 = vst [vmem:[%s544_s3 + $0x58] sm:$0xff] %v185_v24  ;;  %v222_v25 = vadd.f32 %v221_v23, %v173_v18  ;;  %v197_v26 = vpop.f32.mrf.mxu3 }
  0xa9   :  { %215 = vst [vmem:[%s544_s3 + $0x78] sm:$0xff] %v197_v26 }
  0xaa   :  { %v223_v27 = vadd.f32 %v222_v25, %v468_v4 }
  0xac   :  { %v224_v28 = vadd.f32 %v223_v27, %v486_v10 }
  0xae   :  { %v225_v29 = vadd.f32 %v224_v28, %v182_v16 }
  0xb0   :  { %v226_v30 = vadd.f32 %v225_v29, %v185_v24 }
  0xb2   :  { %v227_v31 = vadd.f32 %v226_v30, %v477_v9 }
  0xb4   :  { %v228_v32 = vadd.f32 %v227_v31, %v495_v13 }
  0xb6   :  { %v229_v33 = vadd.f32 %v228_v32, %v510_v20 }
  0xb8   :  { %v230_v34 = vadd.f32 %v229_v33, %v197_v26 }
  0xba   :  { %v231_v35 = vrot.slane %v230_v34, 4 }
  0xbc   :  { %v232_v36 = vadd.f32 %v231_v35, %v230_v34 }
  0xbe   :  { %v233_v37 = vrot.slane %v232_v36, 2 }
  0xc0   :  { %v234_v38 = vadd.f32 %v233_v37, %v232_v36 }
  0xc2   :  { %v235_v39 = vrot.slane %v234_v38, 1 }
  0xc4   :  { %v236_v40 = vadd.f32 %v235_v39, %v234_v38 }
  0xc6   :  { %v237_v41 = vmul.f32 0.0078125, %v236_v40  ;;  %254 = vst [vmem:[%s545_s4] sm:$0x1] %v236_v40 }
  0xc8   :  { %v238_v42 = vsub.f32 %v152_v5, %v237_v41  ;;  %v239_v43 = vsub.f32 %v155_v7, %v237_v41  ;;  %v240_v44 = vsub.f32 %v158_v11, %v237_v41  ;;  %v241_v47 = vsub.f32 %v161_v17, %v237_v41 }
  0xc9   :  { %v242_v48 = vsub.f32 %v164_v6, %v237_v41  ;;  %v243_v51 = vsub.f32 %v167_v8, %v237_v41  ;;  %v244_v54 = vsub.f32 %v170_v12, %v237_v41  ;;  %v245_v57 = vsub.f32 %v173_v18, %v237_v41 }
  0xca   :  { %v255_v45 = vmul.f32 %v238_v42, %v238_v42  ;;  %v256_v46 = vmul.f32 %v239_v43, %v239_v43  ;;  %v257_v49 = vmul.f32 %v240_v44, %v240_v44  ;;  %v258_v52 = vmul.f32 %v241_v47, %v241_v47 }
  0xcb   :  { %v259_v55 = vmul.f32 %v242_v48, %v242_v48  ;;  %v260_v58 = vmul.f32 %v243_v51, %v243_v51  ;;  %v246_v60 = vsub.f32 %v468_v4, %v237_v41  ;;  %v261_v61 = vmul.f32 %v244_v54, %v244_v54 }
  0xcc   :  { %v271_v50 = vadd.f32 %v256_v46, %v255_v45  ;;  %v247_v63 = vsub.f32 %v486_v10, %v237_v41  ;;  %v262_v0 = vmul.f32 %v245_v57, %v245_v57  ;;  %v248_v2 = vsub.f32 %v182_v16, %v237_v41 }
  0xcd   :  { %v263_v3 = vmul.f32 %v246_v60, %v246_v60  ;;  %v249_v6 = vsub.f32 %v185_v24, %v237_v41  ;;  %v250_v11 = vsub.f32 %v477_v9, %v237_v41  ;;  %v251_v15 = vsub.f32 %v495_v13, %v237_v41 }
  0xce   :  { %v272_v53 = vadd.f32 %v271_v50, %v257_v49  ;;  %v264_v7 = vmul.f32 %v247_v63, %v247_v63  ;;  %v265_v12 = vmul.f32 %v248_v2, %v248_v2  ;;  %v252_v18 = vsub.f32 %v510_v20, %v237_v41 }
  0xcf   :  { %v266_v17 = vmul.f32 %v249_v6, %v249_v6  ;;  %v267_v19 = vmul.f32 %v250_v11, %v250_v11  ;;  %v253_v21 = vsub.f32 %v197_v26, %v237_v41  ;;  %v268_v22 = vmul.f32 %v251_v15, %v251_v15 }
  0xd0   :  { %v273_v56 = vadd.f32 %v272_v53, %v258_v52  ;;  %v269_v23 = vmul.f32 %v252_v18, %v252_v18 }
  0xd1   :  { %v270_v24 = vmul.f32 %v253_v21, %v253_v21 }
  0xd2   :  { %v274_v59 = vadd.f32 %v273_v56, %v259_v55 }
  0xd4   :  { %v275_v62 = vadd.f32 %v274_v59, %v260_v58 }
  0xd6   :  { %v276_v1 = vadd.f32 %v275_v62, %v261_v61 }
  0xd8   :  { %v277_v5 = vadd.f32 %v276_v1, %v262_v0 }
  0xda   :  { %v278_v8 = vadd.f32 %v277_v5, %v263_v3 }
  0xdc   :  { %v279_v14 = vadd.f32 %v278_v8, %v264_v7 }
  0xde   :  { %v280_v4 = vadd.f32 %v279_v14, %v265_v12 }
  0xe0   :  { %v281_v10 = vadd.f32 %v280_v4, %v266_v17 }
  0xe2   :  { %v282_v16 = vadd.f32 %v281_v10, %v267_v19 }
  0xe4   :  { %v283_v25 = vadd.f32 %v282_v16, %v268_v22 }
  0xe6   :  { %v284_v27 = vadd.f32 %v283_v25, %v269_v23 }
  0xe8   :  { %v285_v28 = vadd.f32 %v284_v27, %v270_v24 }
  0xea   :  { %v286_v29 = vrot.slane %v285_v28, 4 }
  0xec   :  { %v287_v9 = vadd.f32 %v286_v29, %v285_v28 }
  0xee   :  { %v288_v30 = vrot.slane %v287_v9, 2 }
  0xf0   :  { %v289_v31 = vadd.f32 %v288_v30, %v287_v9 }
  0xf2   :  { %v290_v32 = vrot.slane %v289_v31, 1 }
  0xf4   :  { %v291_v13 = vadd.f32 %v290_v32, %v289_v31 }
  0xf6   :  { %292 = vst [vmem:[%s545_s4 + $0x1] sm:$0x1] %v291_v13 }

// kernel: ring_embedding_forward.10
= control target key start
LH: loop header
LB: loop body
LE: loop exit
PB: predicated region body
PF: predicated region fallthrough
CT: control target
= control target key end

     0   :  { %vm165_vm0 = vcmask 261120   ;;  %vm236_vm1 = vcmask 253952   ;;  %s692_s2 = inlined_call_operand.vmem [shape: f32[128,32], index: 2, kind: input, shape index: {}]   ;;  %s693_s1 = inlined_call_operand.vmem [shape: f32[2,128], index: 1, kind: input, shape index: {}]   ;;  %s694_s0 = inlined_call_operand.vmem [shape: f32[128,128], index: 0, kind: input, shape index: {}]   ;;  %s695_s3 = inlined_call_operand.vmem [shape: f32[128,32], index: 3, kind: output, shape index: {0}]   ;;  %s696_s4 = inlined_call_operand.vmem [shape: f32[1,2,32], index: 4, kind: output, shape index: {1}]  }
   0x1   :  { %v99_v0 = vld [vmem:[%s692_s2 + $0x78] sm:$0xff]  ;;  %v98_v1 = vld [vmem:[%s692_s2 + $0x70] sm:$0xff]  ;;  %v97_v2 = vld [vmem:[%s692_s2 + $0x68] sm:$0xff] }
   0x2   :  { %100 = vmatpush.msra.mxu0 %v99_v0  ;;  %300 = vmatpush.msra.mxu1 %v99_v0  ;;  %v96_v3 = vld [vmem:[%s692_s2 + $0x60] sm:$0xff]  ;;  %v95_v4 = vld [vmem:[%s692_s2 + $0x58] sm:$0xff]  ;;  %v94_v5 = vld [vmem:[%s692_s2 + $0x50] sm:$0xff] }
   0x3   :  { %301 = vmatpush.msra.mxu2 %v99_v0  ;;  %302 = vmatpush.msra.mxu3 %v99_v0  ;;  %v93_v6 = vld [vmem:[%s692_s2 + $0x48] sm:$0xff]  ;;  %v92_v7 = vld [vmem:[%s692_s2 + $0x40] sm:$0xff]  ;;  %v91_v8 = vld [vmem:[%s692_s2 + $0x38] sm:$0xff] }
   0x4   :  { %101 = vmatpush.msra.mxu0 %v98_v1  ;;  %303 = vmatpush.msra.mxu1 %v98_v1  ;;  %v90_v9 = vld [vmem:[%s692_s2 + $0x30] sm:$0xff]  ;;  %v408_v10 = vld [vmem:[%s693_s1] ss:$0 sm:$0xff]  ;;  %v89_v13 = vld [vmem:[%s692_s2 + $0x28] sm:$0xff] }
   0x5   :  { %304 = vmatpush.msra.mxu2 %v98_v1  ;;  %305 = vmatpush.msra.mxu3 %v98_v1  ;;  %v16_v11 = vld [vmem:[%s694_s0] sm:$0xff]  ;;  %v87_v20 = vld [vmem:[%s692_s2 + $0x18] sm:$0xff]  ;;  %v86_v23 = vld [vmem:[%s692_s2 + $0x10] sm:$0xff] }
   0x6   :  { %102 = vmatpush.msra.mxu0 %v97_v2  ;;  %306 = vmatpush.msra.mxu1 %v97_v2  ;;  %v20_v12 = vld [vmem:[%s694_s0 + $0x20] sm:$0xff]  ;;  %v34_v17 = vmul.f32 %v408_v10, %v16_v11  ;;  %v17_v26 = vld [vmem:[%s694_s0 + $0x8] sm:$0xff]  ;;  %v18_v44 = vld [vmem:[%s694_s0 + $0x10] sm:$0xff] }
   0x7   :  { %307 = vmatpush.msra.mxu2 %v97_v2  ;;  %308 = vmatpush.msra.mxu3 %v97_v2  ;;  %v24_v14 = vld [vmem:[%s694_s0 + $0x40] sm:$0xff]  ;;  %v38_v19 = vmul.f32 %v408_v10, %v20_v12  ;;  %v21_v27 = vld [vmem:[%s694_s0 + $0x28] sm:$0xff]  ;;  %v35_v35 = vmul.f32 %v408_v10, %v17_v26  ;;  %v22_v45 = vld [vmem:[%s694_s0 + $0x30] sm:$0xff]  ;;  %v36_v51 = vmul.f32 %v408_v10, %v18_v44 }
   0x8   :  { %103 = vmatpush.msra.mxu0 %v96_v3  ;;  %309 = vmatpush.msra.mxu1 %v96_v3  ;;  %v28_v15 = vld [vmem:[%s694_s0 + $0x60] sm:$0xff]  ;;  %v42_v21 = vmul.f32 %v408_v10, %v24_v14  ;;  %v85_v28 = vld [vmem:[%s692_s2 + $0x8] sm:$0xff]  ;;  %v39_v37 = vmul.f32 %v408_v10, %v21_v27  ;;  %v26_v48 = vld [vmem:[%s694_s0 + $0x50] sm:$0xff]  ;;  %v40_v53 = vmul.f32 %v408_v10, %v22_v45 }
   0x9   :  { %310 = vmatpush.msra.mxu2 %v96_v3  ;;  %311 = vmatpush.msra.mxu3 %v96_v3  ;;  %v88_v16 = vld [vmem:[%s692_s2 + $0x20] sm:$0xff]  ;;  %v46_v22 = vmul.f32 %v408_v10, %v28_v15  ;;  %v25_v31 = vld [vmem:[%s694_s0 + $0x48] sm:$0xff]  ;;  %v30_v49 = vld [vmem:[%s694_s0 + $0x70] sm:$0xff]  ;;  %v44_v55 = vmul.f32 %v408_v10, %v26_v48 }
   0xa   :  { %104 = vmatpush.msra.mxu0 %v95_v4  ;;  %312 = vmatpush.msra.mxu1 %v95_v4  ;;  %v432_v18 = vld [vmem:[%s693_s1 + $0x1] ss:$0 sm:$0xff]  ;;  %v29_v32 = vld [vmem:[%s694_s0 + $0x68] sm:$0xff]  ;;  %v43_v39 = vmul.f32 %v408_v10, %v25_v31  ;;  %v48_v57 = vmul.f32 %v408_v10, %v30_v49  ;;  %v19_v60 = vld [vmem:[%s694_s0 + $0x18] sm:$0xff] }
   0xb   :  { %313 = vmatpush.msra.mxu2 %v95_v4  ;;  %314 = vmatpush.msra.mxu3 %v95_v4  ;;  %v52_v24 = vadd.f32 %v432_v18, %v34_v17  ;;  %v56_v25 = vadd.f32 %v432_v18, %v38_v19  ;;  %v60_v29 = vadd.f32 %v432_v18, %v42_v21  ;;  %v84_v33 = vld [vmem:[%s692_s2] sm:$0xff]  ;;  %v23_v61 = vld [vmem:[%s694_s0 + $0x38] sm:$0xff] }
   0xc   :  { %105 = vmatpush.msra.mxu0 %v94_v5  ;;  %315 = vmatpush.msra.mxu1 %v94_v5  ;;  %v64_v30 = vadd.f32 %v432_v18, %v46_v22  ;;  %v47_v41 = vmul.f32 %v408_v10, %v29_v32  ;;  %v53_v42 = vadd.f32 %v432_v18, %v35_v35  ;;  %v27_v0 = vld [vmem:[%s694_s0 + $0x58] sm:$0xff] }
   0xd   :  { %316 = vmatpush.msra.mxu2 %v94_v5  ;;  %317 = vmatpush.msra.mxu3 %v94_v5  ;;  %v68_v34 = vmax.f32 %v52_v24, 0.0  ;;  %v72_v36 = vmax.f32 %v56_v25, 0.0  ;;  %v76_v38 = vmax.f32 %v60_v29, 0.0  ;;  %v57_v43 = vadd.f32 %v432_v18, %v39_v37  ;;  %v31_v1 = vld [vmem:[%s694_s0 + $0x78] sm:$0xff] }
   0xe   :  { %106 = vmatpush.msra.mxu0 %v93_v6  ;;  %318 = vmatpush.msra.mxu1 %v93_v6  ;;  %v80_v40 = vmax.f32 %v64_v30, 0.0  ;;  %v61_v46 = vadd.f32 %v432_v18, %v43_v39  ;;  %v65_v47 = vadd.f32 %v432_v18, %v47_v41  ;;  %v69_v50 = vmax.f32 %v53_v42, 0.0 }
   0xf   :  { %319 = vmatpush.msra.mxu2 %v93_v6  ;;  %320 = vmatpush.msra.mxu3 %v93_v6  ;;  %v73_v52 = vmax.f32 %v57_v43, 0.0  ;;  %v54_v58 = vadd.f32 %v432_v18, %v36_v51  ;;  %v58_v59 = vadd.f32 %v432_v18, %v40_v53  ;;  %v62_v62 = vadd.f32 %v432_v18, %v44_v55 }
  0x10   :  { %107 = vmatpush.msra.mxu0 %v92_v7  ;;  %321 = vmatpush.msra.mxu1 %v92_v7  ;;  %v77_v54 = vmax.f32 %v61_v46, 0.0  ;;  %v81_v56 = vmax.f32 %v65_v47, 0.0  ;;  %v66_v63 = vadd.f32 %v432_v18, %v48_v57  ;;  %v37_v3 = vmul.f32 %v408_v10, %v19_v60 }
  0x11   :  { %322 = vmatpush.msra.mxu2 %v92_v7  ;;  %323 = vmatpush.msra.mxu3 %v92_v7  ;;  %v70_v2 = vmax.f32 %v54_v58, 0.0  ;;  %v74_v4 = vmax.f32 %v58_v59, 0.0  ;;  %v41_v5 = vmul.f32 %v408_v10, %v23_v61  ;;  %v78_v6 = vmax.f32 %v62_v62, 0.0 }
  0x12   :  { %108 = vmatpush.msra.mxu0 %v91_v8  ;;  %324 = vmatpush.msra.mxu1 %v91_v8  ;;  %v45_v7 = vmul.f32 %v408_v10, %v27_v0  ;;  %v55_v11 = vadd.f32 %v432_v18, %v37_v3 }
  0x13   :  { %325 = vmatpush.msra.mxu2 %v91_v8  ;;  %326 = vmatpush.msra.mxu3 %v91_v8  ;;  %v82_v8 = vmax.f32 %v66_v63, 0.0  ;;  %v59_v12 = vadd.f32 %v432_v18, %v41_v5 }
  0x14   :  { %109 = vmatpush.msra.mxu0 %v90_v9  ;;  %327 = vmatpush.msra.mxu1 %v90_v9  ;;  %v71_v15 = vmax.f32 %v55_v11, 0.0 }
  0x15   :  { %328 = vmatpush.msra.mxu2 %v90_v9  ;;  %329 = vmatpush.msra.mxu3 %v90_v9  ;;  %v49_v9 = vmul.f32 %v408_v10, %v31_v1 }
  0x16   :  { %110 = vmatpush.msra.mxu0 %v89_v13  ;;  %330 = vmatpush.msra.mxu1 %v89_v13 }
  0x17   :  { %331 = vmatpush.msra.mxu2 %v89_v13  ;;  %332 = vmatpush.msra.mxu3 %v89_v13  ;;  %v63_v13 = vadd.f32 %v432_v18, %v45_v7  ;;  %v67_v14 = vadd.f32 %v432_v18, %v49_v9 }
  0x18   :  { %111 = vmatpush.msra.mxu0 %v88_v16  ;;  %333 = vmatpush.msra.mxu1 %v88_v16 }
  0x19   :  { %334 = vmatpush.msra.mxu2 %v88_v16  ;;  %335 = vmatpush.msra.mxu3 %v88_v16  ;;  %v75_v16 = vmax.f32 %v59_v12, 0.0  ;;  %v79_v17 = vmax.f32 %v63_v13, 0.0  ;;  %v83_v19 = vmax.f32 %v67_v14, 0.0 }
  0x1a   :  { %112 = vmatpush.msra.mxu0 %v87_v20  ;;  %336 = vmatpush.msra.mxu1 %v87_v20 }
  0x1b   :  { %337 = vmatpush.msra.mxu2 %v87_v20  ;;  %338 = vmatpush.msra.mxu3 %v87_v20 }
  0x1c   :  { %113 = vmatpush.msra.mxu0 %v86_v23  ;;  %339 = vmatpush.msra.mxu1 %v86_v23 }
  0x1d   :  { %340 = vmatpush.msra.mxu2 %v86_v23  ;;  %341 = vmatpush.msra.mxu3 %v86_v23 }
  0x1e   :  { %114 = vmatpush.msra.mxu0 %v85_v28  ;;  %342 = vmatpush.msra.mxu1 %v85_v28 }
  0x1f   :  { %343 = vmatpush.msra.mxu2 %v85_v28  ;;  %344 = vmatpush.msra.mxu3 %v85_v28 }
  0x20   :  { %115 = vmatpush.msra.mxu0 %v84_v33  ;;  %345 = vmatpush.msra.mxu1 %v84_v33 }
  0x21   :  { %116 = vmatmul.f32.vlgmr.msra.gmra.mxu0 %v68_v34  ;;  %128 = vmatmul.f32.vlgmr.msra.gmra.mxu1 %v72_v36 }
  0x22   :  { %346 = vmatpush.msra.mxu2 %v84_v33  ;;  %347 = vmatpush.msra.mxu3 %v84_v33 }
  0x23   :  { %140 = vmatmul.f32.vlgmr.msra.gmra.mxu2 %v76_v38  ;;  %152 = vmatmul.f32.vlgmr.msra.gmra.mxu3 %v80_v40 }
  0x29   :  { %119 = vmatmul.f32.gmra.mxu0 %v69_v50  ;;  %131 = vmatmul.f32.gmra.mxu1 %v73_v52 }
  0x2b   :  { %143 = vmatmul.f32.gmra.mxu2 %v77_v54  ;;  %155 = vmatmul.f32.gmra.mxu3 %v81_v56 }
  0x31   :  { %122 = vmatmul.f32.gmra.mxu0 %v70_v2  ;;  %134 = vmatmul.f32.gmra.mxu1 %v74_v4 }
  0x33   :  { %146 = vmatmul.f32.gmra.mxu2 %v78_v6  ;;  %158 = vmatmul.f32.gmra.mxu3 %v82_v8 }
  0x39   :  { %125 = vmatmul.f32.gmra.mxu0 %v71_v15  ;;  %137 = vmatmul.f32.gmra.mxu1 %v75_v16 }
  0x3b   :  { %149 = vmatmul.f32.gmra.mxu2 %v79_v17  ;;  %161 = vmatmul.f32.gmra.mxu3 %v83_v19 }
  0x9e   :  { %v513_v10 = vpop.f32.mrf.mxu0  ;;  %v515_v20 = vpop.f32.mrf.mxu1 }
  0x9f   :  { %166 = vst.msk [vmem:[%s695_s3] sm:$0xff] %vm165_vm0, %v513_v10  ;;  %v182_v29 = vsel %vm165_vm0, %v513_v10, 0.0  ;;  %v189_v39 = vsel %vm165_vm0, %v515_v20, 0.0 }
  0xa0   :  { %170 = vst.msk [vmem:[%s695_s3 + $0x20] sm:$0xff] %vm165_vm0, %v515_v20 }
  0xa6   :  { %v527_v18 = vpop.f32.mrf.mxu0  ;;  %v529_v21 = vpop.f32.mrf.mxu1 }
  0xa7   :  { %167 = vst.msk [vmem:[%s695_s3 + $0x8] sm:$0xff] %vm165_vm0, %v527_v18  ;;  %v536_v22 = vpop.f32.mrf.mxu2  ;;  %v538_v23 = vpop.f32.mrf.mxu3  ;;  %v183_v28 = vsel %vm165_vm0, %v527_v18, 0.0  ;;  %v191_v41 = vsel %vm165_vm0, %v529_v21, 0.0 }
  0xa8   :  { %171 = vst.msk [vmem:[%s695_s3 + $0x28] sm:$0xff] %vm165_vm0, %v529_v21  ;;  %v184_v31 = vadd.f32 %v183_v28, %v182_v29  ;;  %v197_v49 = vsel %vm165_vm0, %v536_v22, 0.0  ;;  %v205_v57 = vsel %vm165_vm0, %v538_v23, 0.0 }
  0xa9   :  { %174 = vst.msk [vmem:[%s695_s3 + $0x40] sm:$0xff] %vm165_vm0, %v536_v22 }
  0xaa   :  { %178 = vst.msk [vmem:[%s695_s3 + $0x60] sm:$0xff] %vm165_vm0, %v538_v23 }
  0xae   :  { %v555_v24 = vpop.f32.mrf.mxu0  ;;  %v557_v25 = vpop.f32.mrf.mxu1 }
  0xaf   :  { %168 = vst.msk [vmem:[%s695_s3 + $0x10] sm:$0xff] %vm165_vm0, %v555_v24  ;;  %v564_v26 = vpop.f32.mrf.mxu2  ;;  %v566_v27 = vpop.f32.mrf.mxu3  ;;  %v185_v30 = vsel %vm165_vm0, %v555_v24, 0.0  ;;  %v193_v43 = vsel %vm165_vm0, %v557_v25, 0.0 }
  0xb0   :  { %172 = vst.msk [vmem:[%s695_s3 + $0x30] sm:$0xff] %vm165_vm0, %v557_v25  ;;  %v186_v32 = vadd.f32 %v185_v30, %v184_v31  ;;  %v199_v51 = vsel %vm165_vm0, %v564_v26, 0.0  ;;  %v207_v59 = vsel %vm165_vm0, %v566_v27, 0.0 }
  0xb1   :  { %175 = vst.msk [vmem:[%s695_s3 + $0x48] sm:$0xff] %vm165_vm0, %v564_v26 }
  0xb2   :  { %179 = vst.msk [vmem:[%s695_s3 + $0x68] sm:$0xff] %vm165_vm0, %v566_v27 }
  0xb6   :  { %v126_v33 = vpop.f32.mrf.mxu0  ;;  %v589_v34 = vpop.f32.mrf.mxu1 }
  0xb7   :  { %169 = vst.msk [vmem:[%s695_s3 + $0x18] sm:$0xff] %vm165_vm0, %v126_v33  ;;  %v187_v35 = vsel %vm165_vm0, %v126_v33, 0.0  ;;  %v596_v36 = vpop.f32.mrf.mxu2  ;;  %v598_v37 = vpop.f32.mrf.mxu3  ;;  %v195_v44 = vsel %vm165_vm0, %v589_v34, 0.0 }
  0xb8   :  { %v188_v38 = vadd.f32 %v187_v35, %v186_v32  ;;  %173 = vst.msk [vmem:[%s695_s3 + $0x38] sm:$0xff] %vm165_vm0, %v589_v34  ;;  %v201_v53 = vsel %vm165_vm0, %v596_v36, 0.0  ;;  %v209_v61 = vsel %vm165_vm0, %v598_v37, 0.0 }
  0xb9   :  { %176 = vst.msk [vmem:[%s695_s3 + $0x50] sm:$0xff] %vm165_vm0, %v596_v36 }
  0xba   :  { %v190_v40 = vadd.f32 %v189_v39, %v188_v38  ;;  %180 = vst.msk [vmem:[%s695_s3 + $0x70] sm:$0xff] %vm165_vm0, %v598_v37 }
  0xbc   :  { %v192_v42 = vadd.f32 %v191_v41, %v190_v40 }
  0xbe   :  { %v194_v45 = vadd.f32 %v193_v43, %v192_v42 }
  0xbf   :  { %v623_v46 = vpop.f32.mrf.mxu2  ;;  %v625_v47 = vpop.f32.mrf.mxu3 }
  0xc0   :  { %v196_v48 = vadd.f32 %v195_v44, %v194_v45  ;;  %177 = vst.msk [vmem:[%s695_s3 + $0x58] sm:$0xff] %vm165_vm0, %v623_v46  ;;  %v203_v54 = vsel %vm165_vm0, %v623_v46, 0.0  ;;  %v211_v62 = vsel %vm165_vm0, %v625_v47, 0.0 }
  0xc1   :  { %181 = vst.msk [vmem:[%s695_s3 + $0x78] sm:$0xff] %vm165_vm0, %v625_v47 }
  0xc2   :  { %v198_v50 = vadd.f32 %v197_v49, %v196_v48 }
  0xc4   :  { %v200_v52 = vadd.f32 %v199_v51, %v198_v50 }
  0xc6   :  { %v202_v55 = vadd.f32 %v201_v53, %v200_v52 }
  0xc8   :  { %v204_v56 = vadd.f32 %v203_v54, %v202_v55 }
  0xca   :  { %v206_v58 = vadd.f32 %v205_v57, %v204_v56 }
  0xcc   :  { %v208_v60 = vadd.f32 %v207_v59, %v206_v58 }
  0xce   :  { %v210_v63 = vadd.f32 %v209_v61, %v208_v60 }
  0xd0   :  { %v212_v0 = vadd.f32 %v211_v62, %v210_v63 }
  0xd2   :  { %v213_v1 = vrot.slane %v212_v0, 4 }
  0xd4   :  { %v214_v2 = vadd.f32 %v213_v1, %v212_v0 }
  0xd6   :  { %v215_v3 = vrot.slane %v214_v2, 2 }
  0xd8   :  { %v216_v4 = vadd.f32 %v215_v3, %v214_v2 }
  0xda   :  { %v217_v5 = vrot.slane %v216_v4, 1 }
  0xdc   :  { %v218_v6 = vadd.f32 %v217_v5, %v216_v4 }
  0xde   :  { %v219_v7 = vmul.f32 0.0078125, %v218_v6  ;;  %237 = vst.msk [vmem:[%s696_s4] sm:$0x1] %vm236_vm1, %v218_v6 }
  0xe0   :  { %v220_v8 = vsub.f32 %v513_v10, %v219_v7  ;;  %v221_v9 = vsub.f32 %v527_v18, %v219_v7  ;;  %v222_v11 = vsub.f32 %v555_v24, %v219_v7  ;;  %v223_v12 = vsub.f32 %v126_v33, %v219_v7 }
  0xe1   :  { %v224_v15 = vsub.f32 %v515_v20, %v219_v7  ;;  %v225_v17 = vsub.f32 %v529_v21, %v219_v7  ;;  %v226_v10 = vsub.f32 %v557_v25, %v219_v7  ;;  %v227_v32 = vsub.f32 %v589_v34, %v219_v7 }
  0xe2   :  { %v238_v13 = vmul.f32 %v220_v8, %v220_v8  ;;  %v239_v14 = vmul.f32 %v221_v9, %v221_v9  ;;  %v240_v16 = vmul.f32 %v222_v11, %v222_v11  ;;  %v241_v19 = vmul.f32 %v223_v12, %v223_v12 }
  0xe3   :  { %v242_v31 = vmul.f32 %v224_v15, %v224_v15  ;;  %v243_v33 = vmul.f32 %v225_v17, %v225_v17  ;;  %v228_v21 = vsub.f32 %v536_v22, %v219_v7  ;;  %v244_v38 = vmul.f32 %v226_v10, %v226_v10 }
  0xe4   :  { %v254_v28 = vsel %vm165_vm0, %v238_v13, 0.0  ;;  %v255_v29 = vsel %vm165_vm0, %v239_v14, 0.0  ;;  %v257_v18 = vsel %vm165_vm0, %v240_v16, 0.0  ;;  %v259_v20 = vsel %vm165_vm0, %v241_v19, 0.0 }
  0xe5   :  { %v256_v30 = vadd.f32 %v255_v29, %v254_v28  ;;  %v261_v39 = vsel %vm165_vm0, %v242_v31, 0.0  ;;  %v229_v41 = vsub.f32 %v564_v26, %v219_v7  ;;  %v245_v42 = vmul.f32 %v227_v32, %v227_v32 }
  0xe6   :  { %v263_v25 = vsel %vm165_vm0, %v243_v33, 0.0  ;;  %v230_v44 = vsub.f32 %v596_v36, %v219_v7  ;;  %v246_v45 = vmul.f32 %v228_v21, %v228_v21  ;;  %v265_v34 = vsel %vm165_vm0, %v244_v38, 0.0 }
  0xe7   :  { %v258_v24 = vadd.f32 %v257_v18, %v256_v30  ;;  %v231_v49 = vsub.f32 %v623_v46, %v219_v7  ;;  %v247_v50 = vmul.f32 %v229_v41, %v229_v41  ;;  %v267_v22 = vsel %vm165_vm0, %v245_v42, 0.0 }
  0xe8   :  { %v232_v52 = vsub.f32 %v538_v23, %v219_v7  ;;  %v248_v53 = vmul.f32 %v230_v44, %v230_v44  ;;  %v269_v26 = vsel %vm165_vm0, %v246_v45, 0.0  ;;  %v233_v55 = vsub.f32 %v566_v27, %v219_v7 }
  0xe9   :  { %v260_v35 = vadd.f32 %v259_v20, %v258_v24  ;;  %v249_v56 = vmul.f32 %v231_v49, %v231_v49  ;;  %v271_v36 = vsel %vm165_vm0, %v247_v50, 0.0  ;;  %v234_v58 = vsub.f32 %v598_v37, %v219_v7 }
  0xea   :  { %v250_v59 = vmul.f32 %v232_v52, %v232_v52  ;;  %v273_v46 = vsel %vm165_vm0, %v248_v53, 0.0  ;;  %v235_v61 = vsub.f32 %v625_v47, %v219_v7  ;;  %v251_v62 = vmul.f32 %v233_v55, %v233_v55 }
  0xeb   :  { %v262_v40 = vadd.f32 %v261_v39, %v260_v35  ;;  %v275_v23 = vsel %vm165_vm0, %v249_v56, 0.0  ;;  %v252_v0 = vmul.f32 %v234_v58, %v234_v58 }
  0xec   :  { %v277_v1 = vsel %vm165_vm0, %v250_v59, 0.0  ;;  %v253_v2 = vmul.f32 %v235_v61, %v235_v61  ;;  %v279_v3 = vsel %vm165_vm0, %v251_v62, 0.0 }
  0xed   :  { %v264_v43 = vadd.f32 %v263_v25, %v262_v40  ;;  %v281_v37 = vsel %vm165_vm0, %v252_v0, 0.0 }
  0xee   :  { %v283_v6 = vsel %vm165_vm0, %v253_v2, 0.0 }
  0xef   :  { %v266_v48 = vadd.f32 %v265_v34, %v264_v43 }
  0xf1   :  { %v268_v51 = vadd.f32 %v267_v22, %v266_v48 }
  0xf3   :  { %v270_v54 = vadd.f32 %v269_v26, %v268_v51 }
  0xf5   :  { %v272_v57 = vadd.f32 %v271_v36, %v270_v54 }
  0xf7   :  { %v274_v60 = vadd.f32 %v273_v46, %v272_v57 }
  0xf9   :  { %v276_v63 = vadd.f32 %v275_v23, %v274_v60 }
  0xfb   :  { %v278_v27 = vadd.f32 %v277_v1, %v276_v63 }
  0xfd   :  { %v280_v4 = vadd.f32 %v279_v3, %v278_v27 }
  0xff   :  { %v282_v5 = vadd.f32 %v281_v37, %v280_v4 }
 0x101   :  { %v284_v8 = vadd.f32 %v283_v6, %v282_v5 }
 0x103   :  { %v285_v9 = vrot.slane %v284_v8, 4 }
 0x105   :  { %v286_v47 = vadd.f32 %v285_v9, %v284_v8 }
 0x107   :  { %v287_v7 = vrot.slane %v286_v47, 2 }
 0x109   :  { %v288_v11 = vadd.f32 %v287_v7, %v286_v47 }
 0x10b   :  { %v289_v12 = vrot.slane %v288_v11, 1 }
 0x10d   :  { %v290_v13 = vadd.f32 %v289_v12, %v288_v11 }
 0x10f   :  { %291 = vst.msk [vmem:[%s696_s4 + $0x1] sm:$0x1] %vm236_vm1, %v290_v13 }

// kernel: ring_embedding_forward.11
= control target key start
LH: loop header
LB: loop body
LE: loop exit
PB: predicated region body
PF: predicated region fallthrough
CT: control target
= control target key end

     0   :  { %7 = vsyncpa [#allocation3], 0  ;;  %vm193_vm0 = vcmask 1041409   ;;  %vm196_vm1 = vcmask 1042434   ;;  %vm199_vm2 = vcmask 1043459   ;;  %vm202_vm3 = vcmask 1044484   ;;  %s335_s0 = inlined_call_operand.vmem [shape: f32[128,32], index: 0, kind: input, shape index: {}]   ;;  %s336_s1 = inlined_call_operand.vmem [shape: f32[2,32], index: 1, kind: input, shape index: {}]   ;;  %s337_s2 = inlined_call_operand.hbm [shape: f32[8,32], index: 2, kind: output, shape index: {}]  }
   0x1   :  { %v12_v0 = vld [vmem:[%s335_s0] sm:$0xff]  ;;  %v13_v1 = vld [vmem:[%s335_s0 + $0x8] sm:$0xff]  ;;  %v14_v2 = vld [vmem:[%s335_s0 + $0x10] sm:$0xff]  ;;  %vm205_vm4 = vcmask 1045509   ;;  %vm208_vm5 = vcmask 1046534   ;;  %s223_s19 = sshll.u32 %s337_s2, 4  ;;  %s224_s19 = int_to_ptr.hbm [resolvable:$true] %s223_s19 }
   0x2   :  { %v15_v3 = vld [vmem:[%s335_s0 + $0x18] sm:$0xff]  ;;  %v16_v4 = vld [vmem:[%s335_s0 + $0x20] sm:$0xff]  ;;  %v17_v5 = vld [vmem:[%s335_s0 + $0x28] sm:$0xff]  ;;  %vm211_vm6 = vcmask 1047559   ;;  %vm214_vm7 = vcmask 261120  }
   0x3   :  { %v18_v6 = vld [vmem:[%s335_s0 + $0x30] sm:$0xff]  ;;  %v19_v7 = vld [vmem:[%s335_s0 + $0x38] sm:$0xff]  ;;  %v20_v8 = vld [vmem:[%s335_s0 + $0x40] sm:$0xff] }
   0x4   :  { %v21_v9 = vld [vmem:[%s335_s0 + $0x48] sm:$0xff]  ;;  %v22_v10 = vld [vmem:[%s335_s0 + $0x50] sm:$0xff]  ;;  %v233_v11 = vld [vmem:[%s336_s1] ss:$0 sm:$0xff] }
   0x5   :  { %v23_v12 = vld [vmem:[%s335_s0 + $0x58] sm:$0xff]  ;;  %v24_v13 = vld [vmem:[%s335_s0 + $0x60] sm:$0xff]  ;;  %v25_v14 = vld [vmem:[%s335_s0 + $0x68] sm:$0xff]  ;;  %v30_v17 = vmul.f32 %v233_v11, %v12_v0  ;;  %v31_v18 = vmul.f32 %v233_v11, %v13_v1  ;;  %v32_v19 = vmul.f32 %v233_v11, %v14_v2  ;;  %v33_v20 = vmul.f32 %v233_v11, %v15_v3 }
   0x6   :  { %v26_v15 = vld [vmem:[%s335_s0 + $0x70] sm:$0xff]  ;;  %v27_v16 = vld [vmem:[%s335_s0 + $0x78] sm:$0xff]  ;;  %v234_v21 = vld [vmem:[%s336_s1 + $0x1] ss:$0 sm:$0xff]  ;;  %v34_v22 = vmul.f32 %v233_v11, %v16_v4  ;;  %v35_v23 = vmul.f32 %v233_v11, %v17_v5  ;;  %v36_v24 = vmul.f32 %v233_v11, %v18_v6  ;;  %v37_v25 = vmul.f32 %v233_v11, %v19_v7  ;;  %s261_s0 = smov [#allocation2]  }
   0x7   :  { %v38_v26 = vmul.f32 %v233_v11, %v20_v8  ;;  %v39_v27 = vmul.f32 %v233_v11, %v21_v9  ;;  %v40_v28 = vmul.f32 %v233_v11, %v22_v10  ;;  %v41_v29 = vmul.f32 %v233_v11, %v23_v12  ;;  %s221_s1 = sshll.u32 %s261_s0, 4  ;;  %s222_s1 = int_to_ptr.vmem [resolvable:$true] %s221_s1 }
   0x8   :  { %v42_v30 = vmul.f32 %v233_v11, %v24_v13  ;;  %v43_v31 = vmul.f32 %v233_v11, %v25_v14  ;;  %v44_v32 = vmul.f32 %v233_v11, %v26_v15  ;;  %v45_v33 = vmul.f32 %v233_v11, %v27_v16 }
   0x9   :  { %v48_v34 = vadd.f32 %v234_v21, %v30_v17  ;;  %v49_v35 = vadd.f32 %v234_v21, %v31_v18  ;;  %v50_v36 = vadd.f32 %v234_v21, %v32_v19  ;;  %v51_v37 = vadd.f32 %v234_v21, %v33_v20 }
   0xa   :  { %v52_v38 = vadd.f32 %v234_v21, %v34_v22  ;;  %v53_v39 = vadd.f32 %v234_v21, %v35_v23  ;;  %v54_v40 = vadd.f32 %v234_v21, %v36_v24  ;;  %v55_v41 = vadd.f32 %v234_v21, %v37_v25 }
   0xb   :  { %v56_v42 = vadd.f32 %v234_v21, %v38_v26  ;;  %v57_v43 = vadd.f32 %v234_v21, %v39_v27  ;;  %v58_v44 = vadd.f32 %v234_v21, %v40_v28  ;;  %v59_v45 = vadd.f32 %v234_v21, %v41_v29 }
   0xc   :  { %v60_v46 = vadd.f32 %v234_v21, %v42_v30  ;;  %v61_v47 = vadd.f32 %v234_v21, %v43_v31  ;;  %v62_v48 = vadd.f32 %v234_v21, %v44_v32  ;;  %v63_v49 = vadd.f32 %v234_v21, %v45_v33 }
   0xd   :  { %v64_v50 = vmax.f32 %v48_v34, 0.0  ;;  %v65_v51 = vmax.f32 %v49_v35, 0.0  ;;  %v66_v52 = vmax.f32 %v50_v36, 0.0  ;;  %v67_v53 = vmax.f32 %v51_v37, 0.0 }
   0xe   :  { %v68_v54 = vmax.f32 %v52_v38, 0.0  ;;  %v69_v55 = vmax.f32 %v53_v39, 0.0  ;;  %v70_v56 = vmax.f32 %v54_v40, 0.0  ;;  %v71_v57 = vmax.f32 %v55_v41, 0.0 }
   0xf   :  { %v72_v58 = vmax.f32 %v56_v42, 0.0  ;;  %v73_v59 = vmax.f32 %v57_v43, 0.0  ;;  %v74_v60 = vmax.f32 %v58_v44, 0.0  ;;  %v75_v61 = vmax.f32 %v59_v45, 0.0 }
  0x10   :  { %v76_v62 = vmax.f32 %v60_v46, 0.0  ;;  %v77_v63 = vmax.f32 %v61_v47, 0.0  ;;  %v78_v0 = vmax.f32 %v62_v48, 0.0  ;;  %v79_v1 = vmax.f32 %v63_v49, 0.0 }
  0x11   :  { %v80_v2 = vmax.f32 %v64_v50, %v65_v51  ;;  %v81_v3 = vmax.f32 %v66_v52, %v67_v53  ;;  %v82_v4 = vmax.f32 %v68_v54, %v69_v55  ;;  %v83_v5 = vmax.f32 %v70_v56, %v71_v57 }
  0x12   :  { %v84_v6 = vmax.f32 %v72_v58, %v73_v59  ;;  %v85_v7 = vmax.f32 %v74_v60, %v75_v61  ;;  %v86_v8 = vmax.f32 %v76_v62, %v77_v63  ;;  %v87_v9 = vmax.f32 %v78_v0, %v79_v1 }
  0x13   :  { %v96_v10 = vrot.slane %v80_v2, 4  ;;  %v97_v11 = vrot.slane %v81_v3, 4  ;;  %v98_v12 = vrot.slane %v82_v4, 4  ;;  %v99_v13 = vrot.slane %v83_v5, 4 }
  0x14   :  { %v100_v14 = vrot.slane %v84_v6, 4  ;;  %v101_v15 = vrot.slane %v85_v7, 4  ;;  %v102_v16 = vrot.slane %v86_v8, 4  ;;  %v103_v17 = vrot.slane %v87_v9, 4 }
  0x15   :  { %v112_v18 = vmax.f32 %v80_v2, %v96_v10  ;;  %v113_v19 = vmax.f32 %v81_v3, %v97_v11  ;;  %v114_v20 = vmax.f32 %v82_v4, %v98_v12  ;;  %v115_v21 = vmax.f32 %v83_v5, %v99_v13 }
  0x16   :  { %v116_v22 = vmax.f32 %v84_v6, %v100_v14  ;;  %v117_v23 = vmax.f32 %v85_v7, %v101_v15  ;;  %v118_v24 = vmax.f32 %v86_v8, %v102_v16  ;;  %v119_v25 = vmax.f32 %v87_v9, %v103_v17 }
  0x17   :  { %v128_v26 = vrot.slane %v112_v18, 2  ;;  %v129_v27 = vrot.slane %v113_v19, 2  ;;  %v130_v28 = vrot.slane %v114_v20, 2  ;;  %v131_v29 = vrot.slane %v115_v21, 2 }
  0x18   :  { %v132_v30 = vrot.slane %v116_v22, 2  ;;  %v133_v31 = vrot.slane %v117_v23, 2  ;;  %v134_v32 = vrot.slane %v118_v24, 2  ;;  %v135_v33 = vrot.slane %v119_v25, 2 }
  0x19   :  { %v144_v34 = vmax.f32 %v112_v18, %v128_v26  ;;  %v145_v35 = vmax.f32 %v113_v19, %v129_v27  ;;  %v146_v36 = vmax.f32 %v114_v20, %v130_v28  ;;  %v147_v37 = vmax.f32 %v115_v21, %v131_v29 }
  0x1a   :  { %v148_v38 = vmax.f32 %v116_v22, %v132_v30  ;;  %v149_v39 = vmax.f32 %v117_v23, %v133_v31  ;;  %v150_v40 = vmax.f32 %v118_v24, %v134_v32  ;;  %v151_v41 = vmax.f32 %v119_v25, %v135_v33 }
  0x1b   :  { %v160_v42 = vrot.slane %v144_v34, 1  ;;  %v161_v43 = vrot.slane %v145_v35, 1  ;;  %v162_v44 = vrot.slane %v146_v36, 1  ;;  %v163_v45 = vrot.slane %v147_v37, 1 }
  0x1c   :  { %v164_v46 = vrot.slane %v148_v38, 1  ;;  %v165_v47 = vrot.slane %v149_v39, 1  ;;  %v166_v48 = vrot.slane %v150_v40, 1  ;;  %v167_v49 = vrot.slane %v151_v41, 1 }
  0x1d   :  { %v176_v50 = vmax.f32 %v144_v34, %v160_v42  ;;  %v177_v51 = vmax.f32 %v145_v35, %v161_v43  ;;  %v178_v52 = vmax.f32 %v146_v36, %v162_v44  ;;  %v179_v53 = vmax.f32 %v147_v37, %v163_v45 }
  0x1e   :  { %v180_v54 = vmax.f32 %v148_v38, %v164_v46  ;;  %v181_v55 = vmax.f32 %v149_v39, %v165_v47  ;;  %v182_v56 = vmax.f32 %v150_v40, %v166_v48  ;;  %v183_v57 = vmax.f32 %v151_v41, %v167_v49 }
  0x1f   :  { %v192_v58 = vrot.slane %v177_v51, 7  ;;  %v195_v59 = vrot.slane %v178_v52, 6  ;;  %v198_v60 = vrot.slane %v179_v53, 5 }
  0x20   :  { %v201_v61 = vrot.slane %v180_v54, 4  ;;  %v204_v63 = vrot.slane %v181_v55, 3  ;;  %v207_v1 = vrot.slane %v182_v56, 2  ;;  %v210_v3 = vrot.slane %v183_v57, 1 }
  0x21   :  { %v194_v62 = vsel %vm193_vm0, %v192_v58, %v176_v50 }
  0x22   :  { %v197_v0 = vsel %vm196_vm1, %v195_v59, %v194_v62 }
  0x23   :  { %v200_v2 = vsel %vm199_vm2, %v198_v60, %v197_v0 }
  0x24   :  { %v203_v4 = vsel %vm202_vm3, %v201_v61, %v200_v2 }
  0x25   :  { %v206_v5 = vsel %vm205_vm4, %v204_v63, %v203_v4 }
  0x26   :  { %v209_v6 = vsel %vm208_vm5, %v207_v1, %v206_v5 }
  0x27   :  { %v212_v7 = vsel %vm211_vm6, %v210_v3, %v209_v6 }
  0x28   :  { %215 = vst.msk [vmem:[#allocation2] sm:$0xff] %vm214_vm7, %v212_v7 }
  0x29   :  { %226 = dma.vmem_to_hbm [thread:$0]  %s222_s1, 128, %s224_s19, [#allocation3]  }
  0x2a   :  { %259 = dma.done.wait [#allocation3], 128  }
  0x2b   :  { %260 = vsyncadd [#allocation3], 4294967168 }
  0x2c   :  { %231 = vsyncpa [#allocation3], 1 }

</bundles_post_ra>
